<compile_context>
chip_gen: v7x
topology: tpu7x:2x2x1
jax: 0.10.0
libtpu: 0.0.40
codegen_flags: <defaults>
</compile_context>

<pallas_src>
import math
from functools import partial

import jax
import jax.numpy as jnp
from jax.experimental import pallas as pl
from jax.experimental.pallas import tpu as pltpu

EPS = 1e-5                       # nn.LayerNorm default
BF16 = jnp.bfloat16
_N_LAYER_W = 12                  # wqkv, bqkv, wo, bo, w1, b1, w2, b2, g1, be1, g2, be2


# ---------------------------------------------------------------------------
# Shared in-kernel post-norm TransformerEncoderLayer on a 2D (S, C) f32 tile.
# ---------------------------------------------------------------------------
def _layernorm(t, g, b):
    mu = jnp.mean(t, axis=-1, keepdims=True)
    d = t - mu
    var = jnp.mean(d * d, axis=-1, keepdims=True)          # two-pass, f32 stats
    return d * jax.lax.rsqrt(var + EPS) * g + b


def _encoder_layer(y, w_refs, *, nheads):
    (wqkv, bqkv, wo, bo, w1, b1, w2, b2, g1, be1, g2, be2) = w_refs
    C = y.shape[-1]
    hd = C // nheads

    # Fused QKV projection: one lane-dense (S, C) @ (C, 3C) MXU matmul (bf16 in, f32 acc).
    qkv = jnp.dot(y.astype(BF16), wqkv[...],
                  preferred_element_type=jnp.float32) + bqkv[...]          # (S, 3C) f32
    q_all, k_all, v_all = qkv[:, :C], qkv[:, C:2 * C], qkv[:, 2 * C:]

    heads = []
    for h in range(nheads):                                                # static loop
        sl = slice(h * hd, (h + 1) * hd)
        qh = q_all[:, sl].astype(BF16)
        kh = k_all[:, sl].astype(BF16)
        vh = v_all[:, sl].astype(BF16)
        # scores (1/sqrt(hd) already folded into wqkv/bqkv)
        s = jax.lax.dot_general(qh, kh, (((1,), (1,)), ((), ())),
                                preferred_element_type=jnp.float32)        # (S, S) f32
        s = s - jnp.max(s, axis=-1, keepdims=True)
        p = jnp.exp(s)
        p = p * pl.reciprocal(jnp.sum(p, axis=-1, keepdims=True), approx=True)
        heads.append(jnp.dot(p.astype(BF16), vh,
                             preferred_element_type=jnp.float32))          # (S, hd)
    ctx = jnp.concatenate(heads, axis=-1)                                  # (S, C)

    attn = jnp.dot(ctx.astype(BF16), wo[...],
                   preferred_element_type=jnp.float32) + bo[...]
    src = _layernorm(y + attn, g1[...], be1[...])
    h1 = jax.nn.gelu(jnp.dot(src.astype(BF16), w1[...],
                             preferred_element_type=jnp.float32) + b1[...],
                     approximate=True)
    ff = jnp.dot(h1.astype(BF16), w2[...],
                 preferred_element_type=jnp.float32) + b2[...]
    return _layernorm(src + ff, g2[...], be2[...])


# ---------------------------------------------------------------------------
# Kernel 1: grid=(B, K) -- diffusion-embedding add + time transformer per (L, C) group.
# ---------------------------------------------------------------------------
def _time_kernel(x_ref, dproj_ref, *rest, nheads, apply_layer):
    layer_w = rest[:_N_LAYER_W]
    out_ref = rest[_N_LAYER_W]
    y = x_ref[...].astype(jnp.float32) + dproj_ref[...].astype(jnp.float32)   # (L, C)
    if apply_layer:
        y = _encoder_layer(y, layer_w, nheads=nheads)
    out_ref[...] = y.astype(out_ref.dtype)


# ---------------------------------------------------------------------------
# Kernel 2: grid=(B, L) -- feature transformer per (K, C) group + gating + output proj.
# ---------------------------------------------------------------------------
def _feature_kernel(y_ref, cond_ref, x_ref, *rest, nheads, apply_layer):
    layer_w = rest[:_N_LAYER_W]
    w_mid, w_cond, b_gf, w_out, b_out = rest[_N_LAYER_W:_N_LAYER_W + 5]
    out_ref = rest[_N_LAYER_W + 5]

    y = y_ref[...].astype(jnp.float32)                                        # (K, C)
    if apply_layer:
        y = _encoder_layer(y, layer_w, nheads=nheads)

    C = y.shape[-1]
    cond = cond_ref[...].astype(BF16)
    # fused gate|filter columns; mid and cond biases pre-merged host-side.
    gf = (jnp.dot(y.astype(BF16), w_mid[...], preferred_element_type=jnp.float32)
          + jnp.dot(cond, w_cond[...], preferred_element_type=jnp.float32)
          + b_gf[...])                                                        # (K, 2C)
    z = jax.nn.sigmoid(gf[:, :C]) * jnp.tanh(gf[:, C:])                       # (K, C)

    # output projection: [residual | skip]; 1/sqrt(2) pre-folded into the residual half.
    o = jnp.dot(z.astype(BF16), w_out[...],
                preferred_element_type=jnp.float32) + b_out[...]              # (K, 2C)
    x0 = x_ref[...].astype(jnp.float32) * (1.0 / math.sqrt(2.0))
    res_skip = o + jnp.concatenate([x0, jnp.zeros_like(x0)], axis=-1)
    out_ref[...] = res_skip.astype(out_ref.dtype)                             # lane-dense 2C


# ---------------------------------------------------------------------------
# Host-side parameter preparation (fusions / scale folding / bf16 weight casts).
# ---------------------------------------------------------------------------
def _prep_layer(p, nheads):
    C = p["wo"].shape[0]
    hd = C // nheads
    scale = 1.0 / math.sqrt(hd)
    wqkv = jnp.concatenate([p["wq"] * scale, p["wk"], p["wv"]], axis=1).astype(BF16)
    bqkv = jnp.concatenate([p["bq"] * scale, p["bk"], p["bv"]])[None, :].astype(jnp.float32)
    f32row = lambda v: v[None, :].astype(jnp.float32)
    return (wqkv, bqkv,
            p["wo"].astype(BF16), f32row(p["bo"]),
            p["w1"].astype(BF16), f32row(p["b1"]),
            p["w2"].astype(BF16), f32row(p["b2"]),
            f32row(p["g1"]), f32row(p["be1"]),
            f32row(p["g2"]), f32row(p["be2"]))


def _prep_gating(params):
    C = params["w_mid"].shape[0]
    inv = 1.0 / math.sqrt(2.0)
    col_scale = jnp.concatenate([jnp.full((C,), inv, jnp.float32),
                                 jnp.ones((C,), jnp.float32)])
    return (params["w_mid"].astype(BF16),
            params["w_cond"].astype(BF16),
            (params["b_mid"] + params["b_cond"])[None, :].astype(jnp.float32),
            (params["w_out"] * col_scale[None, :]).astype(BF16),
            (params["b_out"] * col_scale)[None, :].astype(jnp.float32))


def _const_spec(a):
    nd = a.ndim

    def idx(i, j):
        return (0,) * nd

    return pl.BlockSpec(a.shape, idx)


# ---------------------------------------------------------------------------
# Wrapper: two pallas_calls (time grouping, then feature grouping + gated output).
# ---------------------------------------------------------------------------
def residual_block_forward(x, cond_info, diffusion_embedding, params, *, nheads):
    B, K, L, C = x.shape
    assert C % nheads == 0
    Cs = cond_info.shape[-1]

    # tiny (B, E) @ (E, C) projection stays in XLA; broadcast-add fused in kernel 1
    dproj = (diffusion_embedding @ params["w_dp"] + params["b_dp"]).reshape(B, 1, C)

    time_w = _prep_layer(params["time"], nheads)
    feat_w = _prep_layer(params["feature"], nheads)
    gate_w = _prep_gating(params)

    cparams = pltpu.CompilerParams(
        dimension_semantics=("parallel", "parallel"),
        vmem_limit_bytes=32 * 1024 * 1024)

    # ---- kernel 1: one (L, C) time-group per grid step ------------------------
    y1 = pl.pallas_call(
        partial(_time_kernel, nheads=nheads, apply_layer=(L > 1)),
        out_shape=jax.ShapeDtypeStruct((B, K, L, C), jnp.float32),
        grid_spec=pltpu.PrefetchScalarGridSpec(
            num_scalar_prefetch=0,
            grid=(B, K),
            in_specs=[pl.BlockSpec((None, None, L, C), lambda b, k: (b, k, 0, 0)),
                      pl.BlockSpec((None, 1, C), lambda b, k: (b, 0, 0))]
                     + [_const_spec(w) for w in time_w],
            out_specs=pl.BlockSpec((None, None, L, C), lambda b, k: (b, k, 0, 0)),
        ),
        compiler_params=cparams,
    )(x, dproj, *time_w)

    # k-major -> l-major relayout between the two groupings: plain XLA transposes.
    y1_t = jnp.transpose(y1, (0, 2, 1, 3))            # (B, L, K, C)
    cond_t = jnp.transpose(cond_info, (0, 2, 1, 3))   # (B, L, K, Cs)
    x_t = jnp.transpose(x, (0, 2, 1, 3))              # (B, L, K, C)

    # ---- kernel 2: one (K, C) feature-group per grid step + gating/output -----
    out2 = pl.pallas_call(
        partial(_feature_kernel, nheads=nheads, apply_layer=(K > 1)),
        out_shape=jax.ShapeDtypeStruct((B, L, K, 2 * C), x.dtype),
        grid_spec=pltpu.PrefetchScalarGridSpec(
            num_scalar_prefetch=0,
            grid=(B, L),
            in_specs=[pl.BlockSpec((None, None, K, C), lambda b, l: (b, l, 0, 0)),
                      pl.BlockSpec((None, None, K, Cs), lambda b, l: (b, l, 0, 0)),
                      pl.BlockSpec((None, None, K, C), lambda b, l: (b, l, 0, 0))]
                     + [_const_spec(w) for w in feat_w + gate_w],
            out_specs=pl.BlockSpec((None, None, K, 2 * C), lambda b, l: (b, l, 0, 0)),
        ),
        compiler_params=cparams,
    )(y1_t, cond_t, x_t, *feat_w, *gate_w)

    res = jnp.transpose(out2[..., :C], (0, 2, 1, 3))
    skip = jnp.transpose(out2[..., C:], (0, 2, 1, 3))
    return res, skip


# ---------------------------------------------------------------------------
# Deterministic parameter init (raw, PyTorch-like parameterization, channels-last).
# ---------------------------------------------------------------------------
def init_params(key, *, side_dim, channels, demb_dim, nheads, dff):
    ks = iter(jax.random.split(key, 40))

    def dense(shape, fan_in):
        return jax.random.normal(next(ks), shape, jnp.float32) / math.sqrt(fan_in)

    def bias(n):
        return 0.01 * jax.random.normal(next(ks), (n,), jnp.float32)

    def layer():
        return dict(
            wq=dense((channels, channels), channels), bq=bias(channels),
            wk=dense((channels, channels), channels), bk=bias(channels),
            wv=dense((channels, channels), channels), bv=bias(channels),
            wo=dense((channels, channels), channels), bo=bias(channels),
            w1=dense((channels, dff), channels), b1=bias(dff),
            w2=dense((dff, channels), dff), b2=bias(channels),
            g1=jnp.ones((channels,), jnp.float32),
            be1=jnp.zeros((channels,), jnp.float32),
            g2=jnp.ones((channels,), jnp.float32),
            be2=jnp.zeros((channels,), jnp.float32),
        )

    return dict(
        w_dp=dense((demb_dim, channels), demb_dim), b_dp=bias(channels),
        w_mid=dense((channels, 2 * channels), channels), b_mid=bias(2 * channels),
        w_cond=dense((side_dim, 2 * channels), side_dim), b_cond=bias(2 * channels),
        w_out=dense((channels, 2 * channels), channels), b_out=bias(2 * channels),
        time=layer(), feature=layer(),
    )


# ---------------------------------------------------------------------------
# Pure-JAX reference (raw params, explicit transposes / scales / chunks).
# Matmul operands are cast to bf16 at the analogous points so the comparison
# checks the kernel wiring rather than bf16 quantization itself.
# ---------------------------------------------------------------------------
def _encoder_layer_ref(y, p, nheads):                   # y: (N, S, C)
    N, S, C = y.shape
    hd = C // nheads

    def mm(a, w):
        return jnp.einsum('nsc,cd->nsd', a.astype(BF16), w.astype(BF16),
                          preferred_element_type=jnp.float32)

    q = (mm(y, p["wq"]) + p["bq"]).reshape(N, S, nheads, hd)
    k = (mm(y, p["wk"]) + p["bk"]).reshape(N, S, nheads, hd)
    v = (mm(y, p["wv"]) + p["bv"]).reshape(N, S, nheads, hd)
    s = jnp.einsum('nqhd,nkhd->nhqk', q.astype(BF16), k.astype(BF16),
                   preferred_element_type=jnp.float32) / math.sqrt(hd)
    s = s - s.max(-1, keepdims=True)
    pr = jnp.exp(s)
    pr = pr / pr.sum(-1, keepdims=True)
    ctx = jnp.einsum('nhqk,nkhd->nqhd', pr.astype(BF16), v.astype(BF16),
                     preferred_element_type=jnp.float32).reshape(N, S, C)
    attn = mm(ctx, p["wo"]) + p["bo"]

    def ln(t, g, b):
        mu = t.mean(-1, keepdims=True)
        d = t - mu
        var = (d * d).mean(-1, keepdims=True)
        return d * jax.lax.rsqrt(var + EPS) * g + b

    src = ln(y + attn, p["g1"], p["be1"])
    h1 = jax.nn.gelu(mm(src, p["w1"]) + p["b1"], approximate=True)
    ff = mm(h1, p["w2"]) + p["b2"]
    return ln(src + ff, p["g2"], p["be2"])


def residual_block_ref(x, cond, demb, params, nheads):
    B, K, L, C = x.shape
    dproj = demb @ params["w_dp"] + params["b_dp"]
    y = x + dproj[:, None, None, :]
    if L > 1:
        y = _encoder_layer_ref(y.reshape(B * K, L, C), params["time"],
                               nheads).reshape(B, K, L, C)
    y_t = jnp.transpose(y, (0, 2, 1, 3))
    if K > 1:
        y_t = _encoder_layer_ref(y_t.reshape(B * L, K, C), params["feature"],
                                 nheads).reshape(B, L, K, C)
    cond_t = jnp.transpose(cond, (0, 2, 1, 3))

    def mm(a, w):
        return jnp.einsum('blkc,cd->blkd', a.astype(BF16), w.astype(BF16),
                          preferred_element_type=jnp.float32)

    gf = (mm(y_t, params["w_mid"]) + params["b_mid"]
          + mm(cond_t, params["w_cond"]) + params["b_cond"])
    z = jax.nn.sigmoid(gf[..., :C]) * jnp.tanh(gf[..., C:])
    o = mm(z, params["w_out"]) + params["b_out"]
    x_t = jnp.transpose(x, (0, 2, 1, 3))
    res_t = (x_t + o[..., :C]) / math.sqrt(2.0)
    skip_t = o[..., C:]
    return (jnp.transpose(res_t, (0, 2, 1, 3)),
            jnp.transpose(skip_t, (0, 2, 1, 3)))


if __name__ == "__main__":
    # Small CSDI-flavored shapes: C=64 channels, K=4 features x L=16 time steps, B=2.
    B, C, K, L = 2, 64, 4, 16
    SIDE_DIM, DEMB, NHEADS, DFF = 16, 32, 4, 64     # dim_feedforward=64 as in CSDI

    key = jax.random.PRNGKey(0)
    k1, k2, k3, kp = jax.random.split(key, 4)
    x = jax.random.normal(k1, (B, K, L, C), jnp.float32)
    cond_info = jax.random.normal(k2, (B, K, L, SIDE_DIM), jnp.float32)
    diffusion_embedding = jax.random.normal(k3, (B, DEMB), jnp.float32)
    params = init_params(kp, side_dim=SIDE_DIM, channels=C, demb_dim=DEMB,
                         nheads=NHEADS, dff=DFF)

    res, skip = residual_block_forward(x, cond_info, diffusion_embedding, params,
                                       nheads=NHEADS)
    jax.block_until_ready((res, skip))
    assert res.shape == (B, K, L, C) and skip.shape == (B, K, L, C)

    res_r, skip_r = residual_block_ref(x, cond_info, diffusion_embedding, params, NHEADS)
    err = max(float(jnp.max(jnp.abs(res - res_r))),
              float(jnp.max(jnp.abs(skip - skip_r))))
    # Tolerance covers approx reciprocal in the softmax, EUP transcendental vs XLA
    # differences, and bf16 requantization of the 1/sqrt(2)-folded output weights.
    assert err < 2e-2, f"mismatch vs reference: {err}"

    print("KERNEL_OK")
</pallas_src>

<mosaic_0001>
module attributes {stable_mosaic.version = 11 : i64} {
  func.func @_time_kernel(%arg0: i32, %arg1: i32, %arg2: memref<1x1x16x64xf32, #tpu.memory_space<vmem>>, %arg3: memref<1x1x64xf32, #tpu.memory_space<vmem>>, %arg4: memref<64x192xbf16, #tpu.memory_space<vmem>>, %arg5: memref<1x192xf32, #tpu.memory_space<vmem>>, %arg6: memref<64x64xbf16, #tpu.memory_space<vmem>>, %arg7: memref<1x64xf32, #tpu.memory_space<vmem>>, %arg8: memref<64x64xbf16, #tpu.memory_space<vmem>>, %arg9: memref<1x64xf32, #tpu.memory_space<vmem>>, %arg10: memref<64x64xbf16, #tpu.memory_space<vmem>>, %arg11: memref<1x64xf32, #tpu.memory_space<vmem>>, %arg12: memref<1x64xf32, #tpu.memory_space<vmem>>, %arg13: memref<1x64xf32, #tpu.memory_space<vmem>>, %arg14: memref<1x64xf32, #tpu.memory_space<vmem>>, %arg15: memref<1x64xf32, #tpu.memory_space<vmem>>, %arg16: memref<1x1x16x64xf32, #tpu.memory_space<vmem>>) attributes {dimension_semantics = [#tpu.dimension_semantics<parallel>, #tpu.dimension_semantics<parallel>], iteration_bounds = array<i64: 2, 4>, scalar_prefetch = 0 : i64, scratch_operands = 0 : i64, tpu.core_type = #tpu.core_type<tc>, window_params = [{transform_indices = @transform_0, window_bounds = array<i64: 1, 1, 16, 64>}, {transform_indices = @transform_1, window_bounds = array<i64: 1, 1, 64>}, {pipeline_mode = #tpu.pipeline_mode<synchronous>, transform_indices = @transform_2, window_bounds = array<i64: 64, 192>}, {pipeline_mode = #tpu.pipeline_mode<synchronous>, transform_indices = @transform_3, window_bounds = array<i64: 1, 192>}, {pipeline_mode = #tpu.pipeline_mode<synchronous>, transform_indices = @transform_4, window_bounds = array<i64: 64, 64>}, {pipeline_mode = #tpu.pipeline_mode<synchronous>, transform_indices = @transform_5, window_bounds = array<i64: 1, 64>}, {pipeline_mode = #tpu.pipeline_mode<synchronous>, transform_indices = @transform_6, window_bounds = array<i64: 64, 64>}, {pipeline_mode = #tpu.pipeline_mode<synchronous>, transform_indices = @transform_7, window_bounds = array<i64: 1, 64>}, {pipeline_mode = #tpu.pipeline_mode<synchronous>, transform_indices = @transform_8, window_bounds = array<i64: 64, 64>}, {pipeline_mode = #tpu.pipeline_mode<synchronous>, transform_indices = @transform_9, window_bounds = array<i64: 1, 64>}, {pipeline_mode = #tpu.pipeline_mode<synchronous>, transform_indices = @transform_10, window_bounds = array<i64: 1, 64>}, {pipeline_mode = #tpu.pipeline_mode<synchronous>, transform_indices = @transform_11, window_bounds = array<i64: 1, 64>}, {pipeline_mode = #tpu.pipeline_mode<synchronous>, transform_indices = @transform_12, window_bounds = array<i64: 1, 64>}, {pipeline_mode = #tpu.pipeline_mode<synchronous>, transform_indices = @transform_13, window_bounds = array<i64: 1, 64>}, {transform_indices = @transform_14, window_bounds = array<i64: 1, 1, 16, 64>}]} {
    %c0 = arith.constant 0 : index
    %c0_0 = arith.constant 0 : index
    %c0_1 = arith.constant 0 : index
    %c0_2 = arith.constant 0 : index
    %0 = vector.load %arg2[%c0, %c0_0, %c0_1, %c0_2] : memref<1x1x16x64xf32, #tpu.memory_space<vmem>>, vector<1x1x16x64xf32>
    %1 = vector.shape_cast %0 : vector<1x1x16x64xf32> to vector<16x64xf32>
    %c0_3 = arith.constant 0 : index
    %c0_4 = arith.constant 0 : index
    %c0_5 = arith.constant 0 : index
    %2 = vector.load %arg3[%c0_3, %c0_4, %c0_5] : memref<1x1x64xf32, #tpu.memory_space<vmem>>, vector<1x1x64xf32>
    %3 = vector.shape_cast %2 : vector<1x1x64xf32> to vector<1x64xf32>
    %4 = vector.broadcast %3 : vector<1x64xf32> to vector<16x64xf32>
    %5 = arith.addf %1, %4 : vector<16x64xf32>
    %6 = arith.truncf %5 : vector<16x64xf32> to vector<16x64xbf16>
    %c0_6 = arith.constant 0 : index
    %c0_7 = arith.constant 0 : index
    %7 = vector.load %arg4[%c0_6, %c0_7] : memref<64x192xbf16, #tpu.memory_space<vmem>>, vector<64x192xbf16>
    %cst = arith.constant dense<0.000000e+00> : vector<16x192xf32>
    %8 = tpu.matmul %6, %7, %cst {dimension_numbers = #tpu.dot_dimension_numbers<[1], [0], [0], [1], [0, 0, 1, 1], [], []>} : vector<16x64xbf16>, vector<64x192xbf16>, vector<16x192xf32> -> vector<16x192xf32>
    %c0_8 = arith.constant 0 : index
    %c0_9 = arith.constant 0 : index
    %9 = vector.load %arg5[%c0_8, %c0_9] : memref<1x192xf32, #tpu.memory_space<vmem>>, vector<1x192xf32>
    %10 = vector.broadcast %9 : vector<1x192xf32> to vector<16x192xf32>
    %11 = arith.addf %8, %10 : vector<16x192xf32>
    %12 = vector.extract_strided_slice %11 {offsets = [0, 0], sizes = [16, 64], strides = [1, 1]} : vector<16x192xf32> to vector<16x64xf32>
    %13 = vector.extract_strided_slice %11 {offsets = [0, 64], sizes = [16, 64], strides = [1, 1]} : vector<16x192xf32> to vector<16x64xf32>
    %14 = vector.extract_strided_slice %11 {offsets = [0, 128], sizes = [16, 64], strides = [1, 1]} : vector<16x192xf32> to vector<16x64xf32>
    %15 = vector.extract_strided_slice %12 {offsets = [0, 0], sizes = [16, 16], strides = [1, 1]} : vector<16x64xf32> to vector<16x16xf32>
    %16 = arith.truncf %15 : vector<16x16xf32> to vector<16x16xbf16>
    %17 = vector.extract_strided_slice %13 {offsets = [0, 0], sizes = [16, 16], strides = [1, 1]} : vector<16x64xf32> to vector<16x16xf32>
    %18 = arith.truncf %17 : vector<16x16xf32> to vector<16x16xbf16>
    %19 = vector.extract_strided_slice %14 {offsets = [0, 0], sizes = [16, 16], strides = [1, 1]} : vector<16x64xf32> to vector<16x16xf32>
    %20 = arith.truncf %19 : vector<16x16xf32> to vector<16x16xbf16>
    %cst_10 = arith.constant dense<0.000000e+00> : vector<16x16xf32>
    %21 = tpu.matmul %16, %18, %cst_10 {dimension_numbers = #tpu.dot_dimension_numbers<[1], [1], [0], [0], [0, 0, 1, 0], [], []>} : vector<16x16xbf16>, vector<16x16xbf16>, vector<16x16xf32> -> vector<16x16xf32>
    %cst_11 = arith.constant dense<0xFF800000> : vector<16xf32>
    %22 = vector.multi_reduction <maximumf>, %21, %cst_11 [1] : vector<16x16xf32> to vector<16xf32>
    %23 = vector.shape_cast %22 : vector<16xf32> to vector<16x1xf32>
    %24 = vector.broadcast %23 : vector<16x1xf32> to vector<16x16xf32>
    %25 = arith.subf %21, %24 : vector<16x16xf32>
    %26 = math.exp %25 : vector<16x16xf32>
    %cst_12 = arith.constant dense<0.000000e+00> : vector<16xf32>
    %27 = vector.multi_reduction <add>, %26, %cst_12 [1] : vector<16x16xf32> to vector<16xf32>
    %28 = vector.shape_cast %27 : vector<16xf32> to vector<16x1xf32>
    %29 = tpu.reciprocal %28 {approx = true} : vector<16x1xf32> -> vector<16x1xf32>
    %30 = vector.broadcast %29 : vector<16x1xf32> to vector<16x16xf32>
    %31 = arith.mulf %26, %30 : vector<16x16xf32>
    %32 = arith.truncf %31 : vector<16x16xf32> to vector<16x16xbf16>
    %cst_13 = arith.constant dense<0.000000e+00> : vector<16x16xf32>
    %33 = tpu.matmul %32, %20, %cst_13 {dimension_numbers = #tpu.dot_dimension_numbers<[1], [0], [0], [1], [0, 0, 1, 1], [], []>} : vector<16x16xbf16>, vector<16x16xbf16>, vector<16x16xf32> -> vector<16x16xf32>
    %34 = vector.extract_strided_slice %12 {offsets = [0, 16], sizes = [16, 16], strides = [1, 1]} : vector<16x64xf32> to vector<16x16xf32>
    %35 = arith.truncf %34 : vector<16x16xf32> to vector<16x16xbf16>
    %36 = vector.extract_strided_slice %13 {offsets = [0, 16], sizes = [16, 16], strides = [1, 1]} : vector<16x64xf32> to vector<16x16xf32>
    %37 = arith.truncf %36 : vector<16x16xf32> to vector<16x16xbf16>
    %38 = vector.extract_strided_slice %14 {offsets = [0, 16], sizes = [16, 16], strides = [1, 1]} : vector<16x64xf32> to vector<16x16xf32>
    %39 = arith.truncf %38 : vector<16x16xf32> to vector<16x16xbf16>
    %cst_14 = arith.constant dense<0.000000e+00> : vector<16x16xf32>
    %40 = tpu.matmul %35, %37, %cst_14 {dimension_numbers = #tpu.dot_dimension_numbers<[1], [1], [0], [0], [0, 0, 1, 0], [], []>} : vector<16x16xbf16>, vector<16x16xbf16>, vector<16x16xf32> -> vector<16x16xf32>
    %cst_15 = arith.constant dense<0xFF800000> : vector<16xf32>
    %41 = vector.multi_reduction <maximumf>, %40, %cst_15 [1] : vector<16x16xf32> to vector<16xf32>
    %42 = vector.shape_cast %41 : vector<16xf32> to vector<16x1xf32>
    %43 = vector.broadcast %42 : vector<16x1xf32> to vector<16x16xf32>
    %44 = arith.subf %40, %43 : vector<16x16xf32>
    %45 = math.exp %44 : vector<16x16xf32>
    %cst_16 = arith.constant dense<0.000000e+00> : vector<16xf32>
    %46 = vector.multi_reduction <add>, %45, %cst_16 [1] : vector<16x16xf32> to vector<16xf32>
    %47 = vector.shape_cast %46 : vector<16xf32> to vector<16x1xf32>
    %48 = tpu.reciprocal %47 {approx = true} : vector<16x1xf32> -> vector<16x1xf32>
    %49 = vector.broadcast %48 : vector<16x1xf32> to vector<16x16xf32>
    %50 = arith.mulf %45, %49 : vector<16x16xf32>
    %51 = arith.truncf %50 : vector<16x16xf32> to vector<16x16xbf16>
    %cst_17 = arith.constant dense<0.000000e+00> : vector<16x16xf32>
    %52 = tpu.matmul %51, %39, %cst_17 {dimension_numbers = #tpu.dot_dimension_numbers<[1], [0], [0], [1], [0, 0, 1, 1], [], []>} : vector<16x16xbf16>, vector<16x16xbf16>, vector<16x16xf32> -> vector<16x16xf32>
    %53 = vector.extract_strided_slice %12 {offsets = [0, 32], sizes = [16, 16], strides = [1, 1]} : vector<16x64xf32> to vector<16x16xf32>
    %54 = arith.truncf %53 : vector<16x16xf32> to vector<16x16xbf16>
    %55 = vector.extract_strided_slice %13 {offsets = [0, 32], sizes = [16, 16], strides = [1, 1]} : vector<16x64xf32> to vector<16x16xf32>
    %56 = arith.truncf %55 : vector<16x16xf32> to vector<16x16xbf16>
    %57 = vector.extract_strided_slice %14 {offsets = [0, 32], sizes = [16, 16], strides = [1, 1]} : vector<16x64xf32> to vector<16x16xf32>
    %58 = arith.truncf %57 : vector<16x16xf32> to vector<16x16xbf16>
    %cst_18 = arith.constant dense<0.000000e+00> : vector<16x16xf32>
    %59 = tpu.matmul %54, %56, %cst_18 {dimension_numbers = #tpu.dot_dimension_numbers<[1], [1], [0], [0], [0, 0, 1, 0], [], []>} : vector<16x16xbf16>, vector<16x16xbf16>, vector<16x16xf32> -> vector<16x16xf32>
    %cst_19 = arith.constant dense<0xFF800000> : vector<16xf32>
    %60 = vector.multi_reduction <maximumf>, %59, %cst_19 [1] : vector<16x16xf32> to vector<16xf32>
    %61 = vector.shape_cast %60 : vector<16xf32> to vector<16x1xf32>
    %62 = vector.broadcast %61 : vector<16x1xf32> to vector<16x16xf32>
    %63 = arith.subf %59, %62 : vector<16x16xf32>
    %64 = math.exp %63 : vector<16x16xf32>
    %cst_20 = arith.constant dense<0.000000e+00> : vector<16xf32>
    %65 = vector.multi_reduction <add>, %64, %cst_20 [1] : vector<16x16xf32> to vector<16xf32>
    %66 = vector.shape_cast %65 : vector<16xf32> to vector<16x1xf32>
    %67 = tpu.reciprocal %66 {approx = true} : vector<16x1xf32> -> vector<16x1xf32>
    %68 = vector.broadcast %67 : vector<16x1xf32> to vector<16x16xf32>
    %69 = arith.mulf %64, %68 : vector<16x16xf32>
    %70 = arith.truncf %69 : vector<16x16xf32> to vector<16x16xbf16>
    %cst_21 = arith.constant dense<0.000000e+00> : vector<16x16xf32>
    %71 = tpu.matmul %70, %58, %cst_21 {dimension_numbers = #tpu.dot_dimension_numbers<[1], [0], [0], [1], [0, 0, 1, 1], [], []>} : vector<16x16xbf16>, vector<16x16xbf16>, vector<16x16xf32> -> vector<16x16xf32>
    %72 = vector.extract_strided_slice %12 {offsets = [0, 48], sizes = [16, 16], strides = [1, 1]} : vector<16x64xf32> to vector<16x16xf32>
    %73 = arith.truncf %72 : vector<16x16xf32> to vector<16x16xbf16>
    %74 = vector.extract_strided_slice %13 {offsets = [0, 48], sizes = [16, 16], strides = [1, 1]} : vector<16x64xf32> to vector<16x16xf32>
    %75 = arith.truncf %74 : vector<16x16xf32> to vector<16x16xbf16>
    %76 = vector.extract_strided_slice %14 {offsets = [0, 48], sizes = [16, 16], strides = [1, 1]} : vector<16x64xf32> to vector<16x16xf32>
    %77 = arith.truncf %76 : vector<16x16xf32> to vector<16x16xbf16>
    %cst_22 = arith.constant dense<0.000000e+00> : vector<16x16xf32>
    %78 = tpu.matmul %73, %75, %cst_22 {dimension_numbers = #tpu.dot_dimension_numbers<[1], [1], [0], [0], [0, 0, 1, 0], [], []>} : vector<16x16xbf16>, vector<16x16xbf16>, vector<16x16xf32> -> vector<16x16xf32>
    %cst_23 = arith.constant dense<0xFF800000> : vector<16xf32>
    %79 = vector.multi_reduction <maximumf>, %78, %cst_23 [1] : vector<16x16xf32> to vector<16xf32>
    %80 = vector.shape_cast %79 : vector<16xf32> to vector<16x1xf32>
    %81 = vector.broadcast %80 : vector<16x1xf32> to vector<16x16xf32>
    %82 = arith.subf %78, %81 : vector<16x16xf32>
    %83 = math.exp %82 : vector<16x16xf32>
    %cst_24 = arith.constant dense<0.000000e+00> : vector<16xf32>
    %84 = vector.multi_reduction <add>, %83, %cst_24 [1] : vector<16x16xf32> to vector<16xf32>
    %85 = vector.shape_cast %84 : vector<16xf32> to vector<16x1xf32>
    %86 = tpu.reciprocal %85 {approx = true} : vector<16x1xf32> -> vector<16x1xf32>
    %87 = vector.broadcast %86 : vector<16x1xf32> to vector<16x16xf32>
    %88 = arith.mulf %83, %87 : vector<16x16xf32>
    %89 = arith.truncf %88 : vector<16x16xf32> to vector<16x16xbf16>
    %cst_25 = arith.constant dense<0.000000e+00> : vector<16x16xf32>
    %90 = tpu.matmul %89, %77, %cst_25 {dimension_numbers = #tpu.dot_dimension_numbers<[1], [0], [0], [1], [0, 0, 1, 1], [], []>} : vector<16x16xbf16>, vector<16x16xbf16>, vector<16x16xf32> -> vector<16x16xf32>
    %91 = tpu.concatenate %33, %52, %71, %90 in 1 : vector<16x16xf32>, vector<16x16xf32>, vector<16x16xf32>, vector<16x16xf32> -> vector<16x64xf32>
    %92 = arith.truncf %91 : vector<16x64xf32> to vector<16x64xbf16>
    %c0_26 = arith.constant 0 : index
    %c0_27 = arith.constant 0 : index
    %93 = vector.load %arg6[%c0_26, %c0_27] : memref<64x64xbf16, #tpu.memory_space<vmem>>, vector<64x64xbf16>
    %cst_28 = arith.constant dense<0.000000e+00> : vector<16x64xf32>
    %94 = tpu.matmul %92, %93, %cst_28 {dimension_numbers = #tpu.dot_dimension_numbers<[1], [0], [0], [1], [0, 0, 1, 1], [], []>} : vector<16x64xbf16>, vector<64x64xbf16>, vector<16x64xf32> -> vector<16x64xf32>
    %c0_29 = arith.constant 0 : index
    %c0_30 = arith.constant 0 : index
    %95 = vector.load %arg7[%c0_29, %c0_30] : memref<1x64xf32, #tpu.memory_space<vmem>>, vector<1x64xf32>
    %96 = vector.broadcast %95 : vector<1x64xf32> to vector<16x64xf32>
    %97 = arith.addf %94, %96 : vector<16x64xf32>
    %98 = arith.addf %5, %97 : vector<16x64xf32>
    %c0_31 = arith.constant 0 : index
    %c0_32 = arith.constant 0 : index
    %99 = vector.load %arg12[%c0_31, %c0_32] : memref<1x64xf32, #tpu.memory_space<vmem>>, vector<1x64xf32>
    %c0_33 = arith.constant 0 : index
    %c0_34 = arith.constant 0 : index
    %100 = vector.load %arg13[%c0_33, %c0_34] : memref<1x64xf32, #tpu.memory_space<vmem>>, vector<1x64xf32>
    %cst_35 = arith.constant dense<0.000000e+00> : vector<16xf32>
    %101 = vector.multi_reduction <add>, %98, %cst_35 [1] : vector<16x64xf32> to vector<16xf32>
    %102 = vector.shape_cast %101 : vector<16xf32> to vector<16x1xf32>
    %cst_36 = arith.constant 6.400000e+01 : f32
    %103 = vector.broadcast %cst_36 : f32 to vector<16x1xf32>
    %104 = arith.divf %102, %103 : vector<16x1xf32>
    %105 = vector.broadcast %104 : vector<16x1xf32> to vector<16x64xf32>
    %106 = arith.subf %98, %105 : vector<16x64xf32>
    %107 = arith.mulf %106, %106 : vector<16x64xf32>
    %cst_37 = arith.constant dense<0.000000e+00> : vector<16xf32>
    %108 = vector.multi_reduction <add>, %107, %cst_37 [1] : vector<16x64xf32> to vector<16xf32>
    %109 = vector.shape_cast %108 : vector<16xf32> to vector<16x1xf32>
    %cst_38 = arith.constant 6.400000e+01 : f32
    %110 = vector.broadcast %cst_38 : f32 to vector<16x1xf32>
    %111 = arith.divf %109, %110 : vector<16x1xf32>
    %cst_39 = arith.constant 9.99999974E-6 : f32
    %112 = vector.broadcast %cst_39 : f32 to vector<16x1xf32>
    %113 = arith.addf %111, %112 : vector<16x1xf32>
    %114 = math.rsqrt %113 : vector<16x1xf32>
    %115 = vector.broadcast %114 : vector<16x1xf32> to vector<16x64xf32>
    %116 = arith.mulf %106, %115 : vector<16x64xf32>
    %117 = vector.broadcast %99 : vector<1x64xf32> to vector<16x64xf32>
    %118 = arith.mulf %116, %117 : vector<16x64xf32>
    %119 = vector.broadcast %100 : vector<1x64xf32> to vector<16x64xf32>
    %120 = arith.addf %118, %119 : vector<16x64xf32>
    %121 = arith.truncf %120 : vector<16x64xf32> to vector<16x64xbf16>
    %c0_40 = arith.constant 0 : index
    %c0_41 = arith.constant 0 : index
    %122 = vector.load %arg8[%c0_40, %c0_41] : memref<64x64xbf16, #tpu.memory_space<vmem>>, vector<64x64xbf16>
    %cst_42 = arith.constant dense<0.000000e+00> : vector<16x64xf32>
    %123 = tpu.matmul %121, %122, %cst_42 {dimension_numbers = #tpu.dot_dimension_numbers<[1], [0], [0], [1], [0, 0, 1, 1], [], []>} : vector<16x64xbf16>, vector<64x64xbf16>, vector<16x64xf32> -> vector<16x64xf32>
    %c0_43 = arith.constant 0 : index
    %c0_44 = arith.constant 0 : index
    %124 = vector.load %arg9[%c0_43, %c0_44] : memref<1x64xf32, #tpu.memory_space<vmem>>, vector<1x64xf32>
    %125 = vector.broadcast %124 : vector<1x64xf32> to vector<16x64xf32>
    %126 = arith.addf %123, %125 : vector<16x64xf32>
    %127 = arith.mulf %126, %126 : vector<16x64xf32>
    %128 = arith.mulf %126, %127 : vector<16x64xf32>
    %cst_45 = arith.constant 4.471500e-02 : f32
    %129 = vector.broadcast %cst_45 : f32 to vector<16x64xf32>
    %130 = arith.mulf %129, %128 : vector<16x64xf32>
    %131 = arith.addf %126, %130 : vector<16x64xf32>
    %cst_46 = arith.constant 0.797884583 : f32
    %132 = vector.broadcast %cst_46 : f32 to vector<16x64xf32>
    %133 = arith.mulf %132, %131 : vector<16x64xf32>
    %134 = math.tanh %133 : vector<16x64xf32>
    %cst_47 = arith.constant 1.000000e+00 : f32
    %135 = vector.broadcast %cst_47 : f32 to vector<16x64xf32>
    %136 = arith.addf %135, %134 : vector<16x64xf32>
    %cst_48 = arith.constant 5.000000e-01 : f32
    %137 = vector.broadcast %cst_48 : f32 to vector<16x64xf32>
    %138 = arith.mulf %137, %136 : vector<16x64xf32>
    %139 = arith.mulf %126, %138 : vector<16x64xf32>
    %140 = arith.truncf %139 : vector<16x64xf32> to vector<16x64xbf16>
    %c0_49 = arith.constant 0 : index
    %c0_50 = arith.constant 0 : index
    %141 = vector.load %arg10[%c0_49, %c0_50] : memref<64x64xbf16, #tpu.memory_space<vmem>>, vector<64x64xbf16>
    %cst_51 = arith.constant dense<0.000000e+00> : vector<16x64xf32>
    %142 = tpu.matmul %140, %141, %cst_51 {dimension_numbers = #tpu.dot_dimension_numbers<[1], [0], [0], [1], [0, 0, 1, 1], [], []>} : vector<16x64xbf16>, vector<64x64xbf16>, vector<16x64xf32> -> vector<16x64xf32>
    %c0_52 = arith.constant 0 : index
    %c0_53 = arith.constant 0 : index
    %143 = vector.load %arg11[%c0_52, %c0_53] : memref<1x64xf32, #tpu.memory_space<vmem>>, vector<1x64xf32>
    %144 = vector.broadcast %143 : vector<1x64xf32> to vector<16x64xf32>
    %145 = arith.addf %142, %144 : vector<16x64xf32>
    %146 = arith.addf %120, %145 : vector<16x64xf32>
    %c0_54 = arith.constant 0 : index
    %c0_55 = arith.constant 0 : index
    %147 = vector.load %arg14[%c0_54, %c0_55] : memref<1x64xf32, #tpu.memory_space<vmem>>, vector<1x64xf32>
    %c0_56 = arith.constant 0 : index
    %c0_57 = arith.constant 0 : index
    %148 = vector.load %arg15[%c0_56, %c0_57] : memref<1x64xf32, #tpu.memory_space<vmem>>, vector<1x64xf32>
    %cst_58 = arith.constant dense<0.000000e+00> : vector<16xf32>
    %149 = vector.multi_reduction <add>, %146, %cst_58 [1] : vector<16x64xf32> to vector<16xf32>
    %150 = vector.shape_cast %149 : vector<16xf32> to vector<16x1xf32>
    %cst_59 = arith.constant 6.400000e+01 : f32
    %151 = vector.broadcast %cst_59 : f32 to vector<16x1xf32>
    %152 = arith.divf %150, %151 : vector<16x1xf32>
    %153 = vector.broadcast %152 : vector<16x1xf32> to vector<16x64xf32>
    %154 = arith.subf %146, %153 : vector<16x64xf32>
    %155 = arith.mulf %154, %154 : vector<16x64xf32>
    %cst_60 = arith.constant dense<0.000000e+00> : vector<16xf32>
    %156 = vector.multi_reduction <add>, %155, %cst_60 [1] : vector<16x64xf32> to vector<16xf32>
    %157 = vector.shape_cast %156 : vector<16xf32> to vector<16x1xf32>
    %cst_61 = arith.constant 6.400000e+01 : f32
    %158 = vector.broadcast %cst_61 : f32 to vector<16x1xf32>
    %159 = arith.divf %157, %158 : vector<16x1xf32>
    %cst_62 = arith.constant 9.99999974E-6 : f32
    %160 = vector.broadcast %cst_62 : f32 to vector<16x1xf32>
    %161 = arith.addf %159, %160 : vector<16x1xf32>
    %162 = math.rsqrt %161 : vector<16x1xf32>
    %163 = vector.broadcast %162 : vector<16x1xf32> to vector<16x64xf32>
    %164 = arith.mulf %154, %163 : vector<16x64xf32>
    %165 = vector.broadcast %147 : vector<1x64xf32> to vector<16x64xf32>
    %166 = arith.mulf %164, %165 : vector<16x64xf32>
    %167 = vector.broadcast %148 : vector<1x64xf32> to vector<16x64xf32>
    %168 = arith.addf %166, %167 : vector<16x64xf32>
    %c0_63 = arith.constant 0 : index
    %c0_64 = arith.constant 0 : index
    %c0_65 = arith.constant 0 : index
    %c0_66 = arith.constant 0 : index
    %169 = vector.load %arg16[%c0_63, %c0_64, %c0_65, %c0_66] : memref<1x1x16x64xf32, #tpu.memory_space<vmem>>, vector<1x1x16x64xf32>
    %170 = vector.shape_cast %169 : vector<1x1x16x64xf32> to vector<16x64xf32>
    %171 = vector.shape_cast %168 : vector<16x64xf32> to vector<1x1x16x64xf32>
    tpu.vector_store %arg16[%c0_63, %c0_64, %c0_65, %c0_66], %171 {strides = array<i32>} : memref<1x1x16x64xf32, #tpu.memory_space<vmem>>, vector<1x1x16x64xf32>,
    return
  }
  func.func @transform_0(%arg0: i32, %arg1: i32) -> (i32, i32, i32, i32) {
    %c0_i32 = arith.constant 0 : i32
    %c0_i32_0 = arith.constant 0 : i32
    %c0_i32_1 = arith.constant 0 : i32
    return %arg0, %arg1, %c0_i32, %c0_i32_0 : i32, i32, i32, i32
  }
  func.func @transform_1(%arg0: i32, %arg1: i32) -> (i32, i32, i32) {
    %c0_i32 = arith.constant 0 : i32
    %c0_i32_0 = arith.constant 0 : i32
    %c0_i32_1 = arith.constant 0 : i32
    return %arg0, %c0_i32, %c0_i32_0 : i32, i32, i32
  }
  func.func @transform_2(%arg0: i32, %arg1: i32) -> (i32, i32) {
    %c0_i32 = arith.constant 0 : i32
    %c0_i32_0 = arith.constant 0 : i32
    %c0_i32_1 = arith.constant 0 : i32
    return %c0_i32, %c0_i32_0 : i32, i32
  }
  func.func @transform_3(%arg0: i32, %arg1: i32) -> (i32, i32) {
    %c0_i32 = arith.constant 0 : i32
    %c0_i32_0 = arith.constant 0 : i32
    %c0_i32_1 = arith.constant 0 : i32
    return %c0_i32, %c0_i32_0 : i32, i32
  }
  func.func @transform_4(%arg0: i32, %arg1: i32) -> (i32, i32) {
    %c0_i32 = arith.constant 0 : i32
    %c0_i32_0 = arith.constant 0 : i32
    %c0_i32_1 = arith.constant 0 : i32
    return %c0_i32, %c0_i32_0 : i32, i32
  }
  func.func @transform_5(%arg0: i32, %arg1: i32) -> (i32, i32) {
    %c0_i32 = arith.constant 0 : i32
    %c0_i32_0 = arith.constant 0 : i32
    %c0_i32_1 = arith.constant 0 : i32
    return %c0_i32, %c0_i32_0 : i32, i32
  }
  func.func @transform_6(%arg0: i32, %arg1: i32) -> (i32, i32) {
    %c0_i32 = arith.constant 0 : i32
    %c0_i32_0 = arith.constant 0 : i32
    %c0_i32_1 = arith.constant 0 : i32
    return %c0_i32, %c0_i32_0 : i32, i32
  }
  func.func @transform_7(%arg0: i32, %arg1: i32) -> (i32, i32) {
    %c0_i32 = arith.constant 0 : i32
    %c0_i32_0 = arith.constant 0 : i32
    %c0_i32_1 = arith.constant 0 : i32
    return %c0_i32, %c0_i32_0 : i32, i32
  }
  func.func @transform_8(%arg0: i32, %arg1: i32) -> (i32, i32) {
    %c0_i32 = arith.constant 0 : i32
    %c0_i32_0 = arith.constant 0 : i32
    %c0_i32_1 = arith.constant 0 : i32
    return %c0_i32, %c0_i32_0 : i32, i32
  }
  func.func @transform_9(%arg0: i32, %arg1: i32) -> (i32, i32) {
    %c0_i32 = arith.constant 0 : i32
    %c0_i32_0 = arith.constant 0 : i32
    %c0_i32_1 = arith.constant 0 : i32
    return %c0_i32, %c0_i32_0 : i32, i32
  }
  func.func @transform_10(%arg0: i32, %arg1: i32) -> (i32, i32) {
    %c0_i32 = arith.constant 0 : i32
    %c0_i32_0 = arith.constant 0 : i32
    %c0_i32_1 = arith.constant 0 : i32
    return %c0_i32, %c0_i32_0 : i32, i32
  }
  func.func @transform_11(%arg0: i32, %arg1: i32) -> (i32, i32) {
    %c0_i32 = arith.constant 0 : i32
    %c0_i32_0 = arith.constant 0 : i32
    %c0_i32_1 = arith.constant 0 : i32
    return %c0_i32, %c0_i32_0 : i32, i32
  }
  func.func @transform_12(%arg0: i32, %arg1: i32) -> (i32, i32) {
    %c0_i32 = arith.constant 0 : i32
    %c0_i32_0 = arith.constant 0 : i32
    %c0_i32_1 = arith.constant 0 : i32
    return %c0_i32, %c0_i32_0 : i32, i32
  }
  func.func @transform_13(%arg0: i32, %arg1: i32) -> (i32, i32) {
    %c0_i32 = arith.constant 0 : i32
    %c0_i32_0 = arith.constant 0 : i32
    %c0_i32_1 = arith.constant 0 : i32
    return %c0_i32, %c0_i32_0 : i32, i32
  }
  func.func @transform_14(%arg0: i32, %arg1: i32) -> (i32, i32, i32, i32) {
    %c0_i32 = arith.constant 0 : i32
    %c0_i32_0 = arith.constant 0 : i32
    %c0_i32_1 = arith.constant 0 : i32
    return %arg0, %arg1, %c0_i32, %c0_i32_0 : i32, i32, i32, i32
  }
}

</mosaic_0001>

<bundles_post_ra>
// kernel: tpu_custom_call.1
= control target key start
LH: loop header
LB: loop body
LE: loop exit
PB: predicated region body
PF: predicated region fallthrough
CT: control target
= control target key end

     0   :  { %s2950_s0 = inlined_call_operand.hbm [shape: f32[2,4,16,64], index: 0, kind: input, shape index: {}]   ;;  %s2951_s1 = inlined_call_operand.vmem [shape: f32[2,1,64], index: 1, kind: input, shape index: {}]   ;;  %s2952_s2 = inlined_call_operand.hbm [shape: bf16[64,192], index: 2, kind: input, shape index: {}]   ;;  %s2953_s3 = inlined_call_operand.vmem [shape: f32[1,192], index: 3, kind: input, shape index: {}]   ;;  %s2954_s4 = inlined_call_operand.hbm [shape: bf16[64,64], index: 4, kind: input, shape index: {}]   ;;  %s2955_s5 = inlined_call_operand.vmem [shape: f32[1,64], index: 5, kind: input, shape index: {}]   ;;  %s2956_s6 = inlined_call_operand.hbm [shape: bf16[64,64], index: 6, kind: input, shape index: {}]   ;;  %s2957_s7 = inlined_call_operand.vmem [shape: f32[1,64], index: 7, kind: input, shape index: {}]   ;;  %s2958_s8 = inlined_call_operand.hbm [shape: bf16[64,64], index: 8, kind: input, shape index: {}]   ;;  %s2959_s9 = inlined_call_operand.vmem [shape: f32[1,64], index: 9, kind: input, shape index: {}]   ;;  %s2960_s10 = inlined_call_operand.vmem [shape: f32[1,64], index: 10, kind: input, shape index: {}]   ;;  %s2961_s11 = inlined_call_operand.vmem [shape: f32[1,64], index: 11, kind: input, shape index: {}]   ;;  %s2962_s12 = inlined_call_operand.vmem [shape: f32[1,64], index: 12, kind: input, shape index: {}]   ;;  %s2963_s13 = inlined_call_operand.vmem [shape: f32[1,64], index: 13, kind: input, shape index: {}]   ;;  %s2964_s14 = inlined_call_operand.hbm [shape: f32[2,4,16,64], index: 14, kind: output, shape index: {}]  }
   0x1   :  { %2975 = sst [smem:[#allocation20_spill]] %s2951_s1 }
   0x2   :  { %2976 = sst [smem:[#allocation21_spill]] %s2952_s2 }
   0x3   :  { %2977 = sst [smem:[#allocation22_spill]] %s2953_s3 }
   0x4   :  { %2978 = sst [smem:[#allocation23_spill]] %s2954_s4 }
   0x5   :  { %2979 = sst [smem:[#allocation24_spill]] %s2955_s5 }
   0x6   :  { %2980 = sst [smem:[#allocation25_spill]] %s2957_s7 }
   0x7   :  { %2981 = sst [smem:[#allocation26_spill]] %s2959_s9 }
   0x8   :  { %2982 = sst [smem:[#allocation27_spill]] %s2960_s10 }
   0x9   :  { %2983 = sst [smem:[#allocation28_spill]] %s2961_s11 }
   0xa   :  { %2984 = sst [smem:[#allocation29_spill]] %s2962_s12 }
   0xb   :  { %2985 = sst [smem:[#allocation30_spill]] %s2963_s13 }
   0xc   :  { %2986 = sst [smem:[#allocation31_spill]] %s2964_s14 }
   0xd   :  { %19 = vsyncpa [#allocation3], 0 }
   0xe   :  { %21 = vsyncpa [#allocation3 + $0x1], 0 }
   0xf   :  { %22 = vsyncpa [#allocation6], 0 }
  0x10   :  { %23 = vsyncpa [#allocation9], 0 }
  0x11   :  { %24 = vsyncpa [#allocation4], 0 }
  0x12   :  { %26 = vsyncpa [#allocation4 + $0x1], 0  ;;  %s2475_s29 = smov 0   ;;  %s2477_s30 = smov 0  }
  0x13   :  { %s2479_s15 = smov 0   ;;  %s2481_s16 = smov 0  }
  0x14   :  { %s2483_s17 = smov 0   ;;  %s2485_s18 = smov 0  }
  0x15   :  { %s2487_s19 = smov 0   ;;  %s2489_s20 = smov 0  }
  0x16 LB: > { %2987 = sst [smem:[#allocation16_spill]] %s2348_s29  ;;  %s1730_s21 = sadd.s32 4294967295, %s2376_s20   ;;  %s2376_s20 = sphi %s2489_s20, %s32_s20   ;;  %s2372_s19 = sphi %s2487_s19, %s3031_s19   ;;  %s2368_s18 = sphi %s2485_s18, %s3030_s18   ;;  %s2364_s17 = sphi %s2483_s17, %s3029_s17   ;;  %s2360_s16 = sphi %s2481_s16, %s3028_s16   ;;  %s2356_s15 = sphi %s2479_s15, %s3027_s15   ;;  %s2352_s30 = sphi %s2477_s30, %s3026_s30   ;;  %s2348_s29 = sphi %s2475_s29, %s3025_s29  }
  0x17   : > { %2988 = sst [smem:[#allocation17_spill]] %s2360_s16  ;;  %s1731_s22 = sadd.s32 4294967294, %s2376_s20  }
  0x18   : > { %2989 = sst [smem:[#allocation18_spill]] %s2364_s17  ;;  %p66_p0 = scmp.ne.s32.totalorder %s2352_s30, %s2348_s29 }
  0x19   : > { %p2519_p1 = scmp.eq.s32.totalorder %s1730_s21, 0  ;;  %p2523_p2 = scmp.eq.s32.totalorder %s1730_s21, 7 }
  0x1a   : > { %p376_p3 = scmp.eq.s32.totalorder %s1731_s22, 7  ;;  %p1732_p5 = scmp.ge.s32.totalorder %s2376_s20, 1 }
  0x1b   : > { %s2990_s23 = scalar_select %p2519_p1, 1, 0 }
  0x1c   : > { %s2991_s24 = scalar_select %p2523_p2, 1, 0 }
  0x1d   : > { %p2529_p4 = por %p2519_p1, %p66_p0  ;;  %p2534_p6 = por %p376_p3, %p66_p0 }
  0x1e   : > { %p383_p7 = scmp.lt.s32.totalorder %s2376_s20, 9  ;;  %s2378_s28 = smov [#allocation5]  }
  0x1f   : > { %s2992_s25 = scalar_select %p2529_p4, 1, 0 }
  0x20   : > { %s2993_s26 = scalar_select %p2534_p6, 1, 0 }
  0x21   : > { %p2539_p8 = pnand %p1732_p5, %p383_p7  ;;  %s395_s21 = sshll.u32 %s2378_s28, 4  ;;  %s396_s21 = int_to_ptr.vmem [resolvable:$true] %s395_s21 }
  0x22   : > { %2994 = sst [smem:[#allocation19_spill]] %s2993_s26  ;;  %s2379_s29 = smov [#allocation8]  }
  0x23   : > { %s2995_s27 = scalar_select %p2539_p8, 1, 0 }
  0x24   : > { %p1930_p9 = pneg %p2539_p8  ;;  %s427_s14 = sshll.u32 %s2379_s29, 4  ;;  %s428_s14 = int_to_ptr.vmem [resolvable:$true] %s427_s14 }
  0x25   : > { %s2997_s2 = sld [smem:[#allocation21_spill]] }
  0x26   : > { %p2547_p10 = pnand %p1930_p9, %p2519_p1 }
  0x28   : > { %p2559_p12 = pneg %p2547_p10 }
  0x2b   : > { %s2128_s12 = scalar_lea.hbm %s2997_s2, 1024 }
  0x2c   : > { %p2129_p11 = scmp.ne.s32.totalorder %s2997_s2, %s2128_s12  ;;  %p2135_p3 = scmp.lt.u32.totalorder %s2128_s12, %s2997_s2 }
  0x2e   : > { %p2131_p13 = pnand %p2559_p12, %p2129_p11 }
  0x30   : > { %p2132_p0 = pneg %p2131_p13 }
  0x32   : > { %p2137_p5 = pnand %p2135_p3, %p2132_p0 }
  0x34   : > { %2140 = shalt.err (!%p2137_p5)
}
  0x35   : > { %s2141_s13 = scalar_lea.vmem %s396_s21, 1024  ;;  %p2149_p1 = scmp.lt.s32.totalorder %s396_s21, %s396_s21 }
  0x36   : > { %p2142_p7 = scmp.ne.s32.totalorder %s396_s21, %s2141_s13  ;;  %p2150_p4 = scmp.lt.s32.totalorder %s2141_s13, %s2141_s13 }
  0x38   : > { %p2144_p9 = pnand %p2142_p7, %p2559_p12  ;;  %p2151_p8 = por %p2150_p4, %p2149_p1 }
  0x3a   : > { %p2145_p6 = pneg %p2144_p9 }
  0x3c   : > { %p2152_p2 = pnand %p2151_p8, %p2145_p6 }
  0x3e   : > { %2155 = shalt.err (!%p2152_p2)
}
  0x3f   : > { %s2973_s9 = smov 128   ;;  %s2974_s29 = smov 8  }
  0x40   : > { %1933 = dma.hbm_to_vmem [thread:$0]  (!%p2547_p10), %s2997_s2, 1024, %s396_s21, [#allocation6], %s2973_s9, %s2973_s9, %s2974_s29  }
  0x41   : > { %s2382_s12 = smov [#allocation7]   ;;  %s2156_s10 = scalar_lea.hbm %s2956_s6, 512 }
  0x42   : > { %s411_s16 = sshll.u32 %s2382_s12, 4  ;;  %p2157_p1 = scmp.ne.s32.totalorder %s2956_s6, %s2156_s10  ;;  %s412_s16 = int_to_ptr.vmem [resolvable:$true] %s411_s16 }
  0x43   : > { %p2163_p6 = scmp.lt.u32.totalorder %s2156_s10, %s2956_s6 }
  0x44   : > { %p2159_p2 = pnand %p2157_p1, %p2559_p12 }
  0x46   : > { %p2160_p4 = pneg %p2159_p2 }
  0x48   : > { %p2165_p8 = pnand %p2163_p6, %p2160_p4 }
  0x4a   : > { %2168 = shalt.err (!%p2165_p8)
}
  0x4b   : > { %s2169_s21 = scalar_lea.vmem %s428_s14, 512  ;;  %p2177_p3 = scmp.lt.s32.totalorder %s428_s14, %s428_s14 }
  0x4c   : > { %p2170_p11 = scmp.ne.s32.totalorder %s428_s14, %s2169_s21  ;;  %p2178_p5 = scmp.lt.s32.totalorder %s2169_s21, %s2169_s21 }
  0x4e   : > { %p2172_p13 = pnand %p2170_p11, %p2559_p12  ;;  %p2179_p7 = por %p2178_p5, %p2177_p3 }
  0x50   : > { %p2173_p0 = pneg %p2172_p13 }
  0x52   : > { %p2180_p9 = pnand %p2179_p7, %p2173_p0 }
  0x54   : > { %2183 = shalt.err (!%p2180_p9)
}
  0x55   : > { %s2383_s3 = smov 64   ;;  %s2384_s5 = smov 4  }
  0x56   : > { %1939 = dma.hbm_to_vmem [thread:$0]  (!%p2547_p10), %s2956_s6, 512, %s428_s14, [#allocation9], %s2383_s3, %s2383_s3, %s2384_s5  }
  0x57   : > { %s2999_s4 = sld [smem:[#allocation23_spill]] }
  0x5d   : > { %s2184_s11 = scalar_lea.hbm %s2999_s4, 512 }
  0x5e   : > { %p2185_p1 = scmp.ne.s32.totalorder %s2999_s4, %s2184_s11  ;;  %p2191_p6 = scmp.lt.u32.totalorder %s2184_s11, %s2999_s4 }
  0x60   : > { %p2187_p2 = pnand %p2185_p1, %p2559_p12 }
  0x62   : > { %p2188_p4 = pneg %p2187_p2 }
  0x64   : > { %p2193_p8 = pnand %p2191_p6, %p2188_p4 }
  0x66   : > { %2196 = shalt.err (!%p2193_p8)
}
  0x67   : > { %s2197_s1 = scalar_lea.vmem %s412_s16, 512  ;;  %p2205_p3 = scmp.lt.s32.totalorder %s412_s16, %s412_s16 }
  0x68   : > { %p2198_p11 = scmp.ne.s32.totalorder %s412_s16, %s2197_s1  ;;  %p2206_p5 = scmp.lt.s32.totalorder %s2197_s1, %s2197_s1 }
  0x6a   : > { %p2200_p13 = pnand %p2198_p11, %p2559_p12  ;;  %p2207_p7 = por %p2206_p5, %p2205_p3 }
  0x6c   : > { %p2201_p0 = pneg %p2200_p13 }
  0x6e   : > { %p2208_p9 = pnand %p2207_p7, %p2201_p0 }
  0x70   : > { %2211 = shalt.err (!%p2208_p9)
}
  0x71   : > { %1936 = dma.hbm_to_vmem [thread:$0]  (!%p2547_p10), %s2999_s4, 512, %s412_s16, [#allocation6], %s2383_s3, %s2383_s3, %s2384_s5  }
  0x72   : > { %s2385_s17 = smov [#allocation10]   ;;  %s2212_s26 = scalar_lea.hbm %s2958_s8, 512 }
  0x73   : > { %s443_s7 = sshll.u32 %s2385_s17, 4  ;;  %p2213_p1 = scmp.ne.s32.totalorder %s2958_s8, %s2212_s26  ;;  %s444_s7 = int_to_ptr.vmem [resolvable:$true] %s443_s7 }
  0x74   : > { %p2219_p6 = scmp.lt.u32.totalorder %s2212_s26, %s2958_s8 }
  0x75   : > { %p2215_p2 = pnand %p2213_p1, %p2559_p12 }
  0x77   : > { %p2216_p4 = pneg %p2215_p2 }
  0x79   : > { %p2221_p8 = pnand %p2219_p6, %p2216_p4 }
  0x7b   : > { %2224 = shalt.err (!%p2221_p8)
}
  0x7c   : > { %s2225_s16 = scalar_lea.vmem %s444_s7, 512  ;;  %p2233_p3 = scmp.lt.s32.totalorder %s444_s7, %s444_s7 }
  0x7d   : > { %p2226_p11 = scmp.ne.s32.totalorder %s444_s7, %s2225_s16  ;;  %p2234_p5 = scmp.lt.s32.totalorder %s2225_s16, %s2225_s16 }
  0x7f   : > { %p2228_p13 = pnand %p2226_p11, %p2559_p12  ;;  %p2235_p7 = por %p2234_p5, %p2233_p3 }
  0x81   : > { %p2229_p0 = pneg %p2228_p13 }
  0x83   : > { %p2236_p9 = pnand %p2235_p7, %p2229_p0 }
  0x85   : > { %2239 = shalt.err (!%p2236_p9)
}
  0x86   : > { %1942 = dma.hbm_to_vmem [thread:$0]  (!%p2547_p10), %s2958_s8, 512, %s444_s7, [#allocation9], %s2383_s3, %s2383_s3, %s2384_s5  }
  0x87   : > { %s41_s28 = sadd.s32 1, %s2368_s18  ;;  %s44_s22 = sadd.s32 1, %s2372_s19 }
  0x88   : > { %p42_p12 = scmp.ge.s32.totalorder %s41_s28, 4  ;;  %s53_s10 = sadd.s32 1, %s2356_s15 }
  0x89   : > { %p60_p1 = scmp.ne.s32.totalorder %s2356_s15, %s2352_s30  ;;  %p61_p2 = scmp.eq.s32.totalorder %s2376_s20, 0 }
  0x8a   : > { %s3033_s28 = smov (%p42_p12, %s41_s28), 0  ;;  %s3035_s22 = smov (!%p42_p12, %s44_s22), %s2372_s19 }
  0x8b   : > { %s49_s17 = ssub.s32 %s2368_s18, %s3033_s28  ;;  %p2652_p4 = por %p61_p2, %p60_p1 }
  0x8c   : > { %p46_p10 = scmp.ge.s32.totalorder %s3035_s22, 2  ;;  %p3001_p6 = scmp.ne.s32.totalorder %s2991_s24, 0 }
  0x8d   : > { %p1955_p11 = scmp.lt.s32.totalorder %s2376_s20, 8  ;;  %s472_s5 = sand.u32 1, %s2356_s15  }
  0x8e   : > { %p2658_p8 = por %p3001_p6, %p60_p1  ;;  %s3037_s22 = smov (%p46_p10, %s3035_s22), 0 }
  0x8f   : > { %s1738_s7 = sshll.u32 %s472_s5, 4  ;;  %s48_s12 = ssub.s32 %s2372_s19, %s3037_s22 }
  0x90   : > { %s50_s26 = sor.u32 %s49_s17, %s48_s12  ;;  %s1739_s13 = sshll.u32 %s2368_s18, 1 }
  0x91   : > { %p51_p13 = scmp.eq.s32.totalorder %s50_s26, 0  ;;  %s1740_s21 = sshll.u32 %s2372_s19, 3 }
  0x92   : > { %s482_s1 = sadd.s32 %s1740_s21, %s1739_s13  ;;  %s476_s16 = scalar_lea.vmem [#allocation2], %s1738_s7 }
  0x93   : > { %s485_s24 = sshll.u32 %s476_s16, 4  ;;  %s1741_s14 = sshll.u32 %s482_s1, 7  ;;  %s2673_s24 = int_to_ptr.vmem [resolvable:$true] %s485_s24 }
  0x94   : > { %s2671_s9 = scalar_select %p51_p13, %s2356_s15, %s53_s10  }
  0x95   : > { %s2678_s4 = scalar_lea.hbm %s2950_s0, %s1741_s14  ;;  %p2684_p0 = pnand %p1955_p11, %p2652_p4 }
  0x96   : > { %s2688_s10 = scalar_lea.sflag [#allocation3], %s472_s5  ;;  %s2240_s7 = scalar_lea.hbm %s2678_s4, 256 }
  0x97   : > { %p2241_p3 = scmp.ne.s32.totalorder %s2678_s4, %s2240_s7  ;;  %p2242_p5 = pneg %p2684_p0 }
  0x98   : > { %s2245_s11 = scalar_lea.hbm %s2950_s0, 2048  ;;  %p2246_p12 = scmp.lt.u32.totalorder %s2678_s4, %s2950_s0 }
  0x99   : > { %p2243_p7 = pnand %p2242_p5, %p2241_p3  ;;  %p2247_p1 = scmp.lt.u32.totalorder %s2245_s11, %s2240_s7 }
  0x9a   : > { %p2249_p4 = scmp.lt.u32.totalorder %s2240_s7, %s2678_s4 }
  0x9b   : > { %p2244_p9 = pneg %p2243_p7  ;;  %p2248_p2 = por %p2247_p1, %p2246_p12 }
  0x9d   : > { %p2250_p10 = por %p2249_p4, %p2248_p2 }
  0x9f   : > { %p2251_p6 = pnand %p2250_p10, %p2244_p9 }
  0xa1   : > { %2254 = shalt.err (!%p2251_p6)
}
  0xa2   : > { %s2255_s5 = scalar_lea.vmem %s2673_s24, 256  ;;  %s2386_s13 = smov [#allocation2]  }
  0xa3   : > { %p2256_p11 = scmp.ne.s32.totalorder %s2673_s24, %s2255_s5  ;;  %s2260_s21 = sshll.u32 %s2386_s13, 4  ;;  %s2261_s21 = int_to_ptr.vmem [resolvable:$false] %s2260_s21 }
  0xa4   : > { %s2262_s1 = scalar_lea.vmem %s2261_s21, 512  ;;  %p2263_p7 = scmp.lt.s32.totalorder %s2673_s24, %s2261_s21 }
  0xa5   : > { %p2258_p13 = pnand %p2256_p11, %p2242_p5  ;;  %p2264_p12 = scmp.lt.s32.totalorder %s2262_s1, %s2255_s5 }
  0xa7   : > { %p2259_p3 = pneg %p2258_p13  ;;  %p2265_p1 = por %p2264_p12, %p2263_p7 }
  0xa9   : > { %p2266_p2 = pnand %p2265_p1, %p2259_p3 }
  0xab   : > { %2269 = shalt.err (!%p2266_p2)
}
  0xac   : > { %s3004_s16 = smov 8   ;;  %s3005_s14 = smov 128  }
  0xad   : > { %1946 = dma.hbm_to_vmem [thread:$0]  (!%p2684_p0), %s2678_s4, 256, %s2673_s24, %s2688_s10, %s3005_s14, %s3005_s14, %s3004_s16  }
  0xae   : > { %p3006_p5 = scmp.ne.s32.totalorder %s2995_s27, 0 }
  0xaf   : > { %s2722_s7 = sand.u32 (!%p3006_p5), 1, %s2352_s30   ;;  %p3007_p9 = scmp.ne.s32.totalorder (!%p3006_p5), %s2992_s25, 0 }
  0xb0   : > { %503 = sbr.rel (%p3006_p5) target bundleno = 3307 (0xceb), region = 76  ;;  %s1743_s2 = sshll.u32 (!%p3006_p5), %s2722_s7, 4 }
  0xb1   : > { %s506_s29 = scalar_lea.sflag (!%p3006_p5), [#allocation3], %s2722_s7  ;;  %s509_s17 = scalar_lea.vmem (!%p3006_p5), [#allocation2], %s1743_s2 }
  0xb7   : > { %2331 = dma.done.wait (%p3007_p9), %s506_s29, 256  }
  0xb8   : > { %2333 = vsyncadd (%p3007_p9), %s506_s29, 4294967040  ;;  %p3008_p0 = scmp.ne.s32.totalorder %s2990_s23, 0 }
  0xba   : > { %2335 = dma.done.wait (%p3008_p0), [#allocation6], 1536  }
  0xbb   : > { %2337 = vsyncadd (%p3008_p0), [#allocation6], 4294965760 }
  0xbc   : > { %2339 = dma.done.wait (%p3008_p0), [#allocation9], 1024  }
  0xbd   : > { %2341 = vsyncadd (%p3008_p0), [#allocation9], 4294966272  ;;  %s3009_s4 = sld [smem:[#allocation18_spill]]  ;;  %v2387_v0 = vmov 0   ;;  %v2060_v1 = vld [vmem:[#allocation5 + $0x4] ss:$8 sps:$4 sm:$0xff]   ;;  %v599_v15 = vlaneseq }
  0xbe   : > { %685 = vmatprep.mubr.bf16.mxu0 %v2387_v0  ;;  %v2062_v2 = vld [vmem:[#allocation5] ss:$8 sps:$4 sm:$0xff]   ;;  %653 = vmatprep.subr.bf16.mxu0 %v2060_v1  ;;  %v2063_v3 = vld [vmem:[#allocation5 + $0x14] ss:$8 sps:$4 sm:$0xff]   ;;  %v2065_v4 = vld [vmem:[#allocation5 + $0x10] ss:$8 sps:$4 sm:$0xff]  }
  0xbf   : > { %654 = vmatpush1.bf16.msra.mxu0 %v2062_v2  ;;  %s3010_s10 = sld [smem:[#allocation20_spill]]  ;;  %v2066_v5 = vld [vmem:[#allocation5 + $0x24] ss:$8 sps:$4 sm:$0xff]   ;;  %v2068_v6 = vld [vmem:[#allocation5 + $0x20] ss:$8 sps:$4 sm:$0xff]   ;;  %vm649_vm0 = vcmask 523264  }
  0xc0   : > { %655 = vmatprep.subr.bf16.mxu0 %v2063_v3  ;;  %v577_v7 = vld [vmem:[%s509_s17] sm:$0xff]  ;;  %v578_v9 = vld [vmem:[%s509_s17 + $0x8] sm:$0xff]  ;;  %v600_v16 = vshrl.u32 %v599_v15, 7  ;;  %v2388_v17 = vmov 0.0   ;;  %s3011_s26 = sld [smem:[#allocation22_spill]]  ;;  %vm2389_vm1 = vmmov 0  }
  0xc1   : > { %v2069_v8 = vld [vmem:[#allocation5 + $0x34] ss:$8 sps:$4 sm:$0xff]   ;;  %v2071_v11 = vld [vmem:[#allocation5 + $0x30] ss:$8 sps:$4 sm:$0xff]   ;;  %1826 = vmatprep.subr.bf16.mxu1 %v2388_v17  ;;  %1828 = vmatprep.mubr.msk.bf16.mxu1 %vm2389_vm1, %v2388_v17  ;;  %s2390_s5 = smov 64   ;;  %vm701_vm2 = vcmask 130048  }
  0xc2   : > { %v601_v18 = vsub.s32 0, %v600_v16  ;;  %v605_v20 = vsub.s32 1, %v600_v16  ;;  %s2391_s13 = smov 48   ;;  %s2392_s21 = smov 96   ;;  %vm1206_vm3 = vcmask 261120   ;;  %vm1209_vm4 = vcmask 392192  }
  0xc3   : > { %p573_p4 = scmp.lt.s32.totalorder %s3009_s4, 1  ;;  %656 = vmatpush1.bf16.msra.mxu0 %v2065_v4  ;;  %s2393_s1 = smov 112  }
  0xc4   : > { %657 = vmatprep.subr.bf16.mxu0 %v2066_v5  ;;  %s2394_s16 = smov 32   ;;  %s2395_s14 = smov 16  }
  0xc5   : > { %s574_s27 = scalar_select %p573_p4, %s3009_s4, 1 }
  0xc6   : > { %v597_v19 = vld [vmem:[%s3011_s26] sm:$0x3]  ;;  %s2396_s29 = smov 80   ;;  %s3012_s25 = sld [smem:[#allocation24_spill]] }
  0xc7   : > { %s575_s11 = scalar_lea.vmem %s3010_s10, %s574_s27  ;;  %658 = vmatpush1.bf16.msra.mxu0 %v2068_v6  ;;  %v602_v21 = vrot.slane %v597_v19, %v601_v18  ;;  %v606_v23 = vrot.slane %v597_v19, %v605_v20  ;;  %s3014_s26 = sld [smem:[#allocation28_spill]] }
  0xc8   : > { %v1749_v10 = vld [vmem:[%s575_s11] ss:$0 sm:$0xff]  ;;  %659 = vmatprep.subr.bf16.mxu0 %v2069_v8  ;;  %s3013_s11 = sld [smem:[#allocation27_spill]]  ;;  %s1791_s27 = sshll.u32 %s3009_s4, 3 }
  0xc9   : > { %v2745_v12 = vadd.f32 %v1749_v10, %v577_v7  ;;  %v2747_v13 = vadd.f32 %v1749_v10, %v578_v9  ;;  %s3018_s10 = sld [smem:[#allocation29_spill]] }
  0xcb   : > { %v588_v14 = vpack.c.bf16 %v2747_v13, %v2745_v12  ;;  %660 = vmatpush1.bf16.msra.mxu0 %v2071_v11 }
  0xcc   : > { %1850 = vmatprep.subr.bf16.mxu0 %v2388_v17 }
  0xce   : > { %1758 = vmatmul.mubr.msk.bf16.vlgmr.msra.gmra.mrb[0].mxu0 %vm649_vm0, %v588_v14 }
  0xcf   : > { %1852 = vmatprep.mubr.msk.bf16.mxu0 %vm2389_vm1, %v2388_v17 }
 0x1a1   : > { %v687_v22 = vpop.f32.mrb[0].mxu0 }
 0x1a2   : > { %v689_v24 = vpop.f32.mrb[1].mxu0  ;;  %v688_v26 = vadd.f32 %v687_v22, %v602_v21 }
 0x1a3   : > { %v691_v25 = vpop.f32.mrb[2].mxu0  ;;  %v690_v29 = vadd.f32 %v689_v24, %v606_v23 }
 0x1a4   : > { %v692_v27 = vadd.f32 %v691_v25, %v602_v21  ;;  %v693_v28 = vpop.f32.mrb[3].mxu0 }
 0x1a5   : > { %v694_v30 = vadd.f32 %v693_v28, %v606_v23 }
 0x1a6   : > { %v696_v31 = vpack.c.bf16 %v692_v27, %v688_v26 }
 0x1a7   : > { %v2761_v32 = vpack.c.bf16 %v694_v30, %v690_v29 }
 0x1a8   : > { %699 = vrot.lane.b32.xlu0 %v696_v31, %s2390_s5 }
 0x21a   : > { %v700_v33 = vpop.permute.xlu0 %699 }
 0x21b   : > { %v706_v34 = vsel %vm701_vm2, %v700_v33, 0 }
 0x21c   : > { %1827 = vmatpush3.bf16.xpose.msra.mxu1 %v706_v34 }
 0x21d   : > { %1832 = vmatprep.subr.bf16.mxu1 %v2388_v17 }
 0x223   : > { %1829 = vmatmul.mubr.msk.bf16.vlgmr.msra.gmra.mrb[0].mxu1 %vm701_vm2, %v696_v31 }
 0x224   : > { %1833 = vmatpush3.bf16.msra.mxu1 %v2761_v32  ;;  %1834 = vmatprep.mubr.msk.bf16.mxu1 %vm2389_vm1, %v2388_v17 }
 0x225   : > { %1838 = vmatprep.subr.bf16.mxu1 %v2388_v17 }
 0x2f6   : > { %v742_v35 = vpop.f32.mrb[0].mxu1 }
 0x2f7   : > { %v1830_v36 = vpop.f32.mrb[1].mxu1  ;;  %v749_v37 = vsel %vm701_vm2, %v742_v35, -inf }
 0x2f8   : > { %750 = vmax.xlane.f32.xlu0 %v749_v37  ;;  %v745_v38 = vpop.f32.mrb[2].mxu1 }
 0x2f9   : > { %v1831_v39 = vpop.f32.mrb[3].mxu1  ;;  %v752_v40 = vsel %vm701_vm2, %v745_v38, -inf }
 0x2fa   : > { %753 = vmax.xlane.f32.xlu1 %v752_v40 }
 0x30b   : > { %818 = vrot.lane.b32.xlu1 %v696_v31, %s2391_s13 }
 0x30e   : > { %938 = vrot.lane.b32.xlu0 %v696_v31, %s2392_s21 }
 0x385   : > { %v751_v41 = vpop.xlane.xlu0 %750 }
 0x386   : > { %v755_v42 = vsub.f32 %v742_v35, %v751_v41 }
 0x387   : > { %v754_v43 = vpop.xlane.xlu1 %753 }
 0x388   : > { %v757_v44 = vmul.f32 1.442695, %v755_v42  ;;  %v756_v45 = vsub.f32 %v745_v38, %v754_v43 }
 0x389   : > { %v939_v63 = vpop.permute.xlu0 %938 }
 0x38a   : > { %2084 = vpow2.f32 %v757_v44  ;;  %v759_v46 = vmul.f32 1.442695, %v756_v45 }
 0x38b   : > { %v819_v51 = vpop.permute.xlu1 %818 }
 0x38c   : > { %2086 = vpow2.f32 %v759_v46  ;;  %v824_v0 = vsel %vm701_vm2, %v819_v51, 0 }
 0x394   : > { %v2085_v47 = vpop.eup %2084 }
 0x395   : > { %v761_v48 = vsel %vm701_vm2, %v2085_v47, 0.0 }
 0x396   : > { %v2087_v49 = vpop.eup %2086  ;;  %762 = vadd.xlane.f32.xlu1 %v761_v48 }
 0x397   : > { %v764_v50 = vsel %vm701_vm2, %v2087_v49, 0.0 }
 0x39a   : > { %765 = vadd.xlane.f32.xlu1 %v764_v50 }
 0x3ab   : > { %816 = vrot.lane.b32.xlu1 %v696_v31, %s2393_s1 }
 0x3af   : > { %940 = vrot.lane.b32.xlu1 %v696_v31, %s2394_s16 }
 0x3b3   : > { %1061 = vrot.lane.b32.xlu1 %v696_v31, %s2395_s14 }
 0x3b7   : > { %1059 = vrot.lane.b32.xlu1 %v696_v31, %s2396_s29 }
 0x423   : > { %v763_v52 = vpop.xlane.xlu1 %762 }
 0x424   : > { %2088 = vrcp.f32 %v763_v52 }
 0x427   : > { %v766_v53 = vpop.xlane.xlu1 %765 }
 0x428   : > { %2090 = vrcp.f32 %v766_v53 }
 0x42b   : > { %v817_v54 = vpop.permute.xlu1 %816 }
 0x42e   : > { %v2089_v56 = vpop.eup %2088 }
 0x42f   : > { %v941_v55 = vpop.permute.xlu1 %940  ;;  %v769_v59 = vmul.f32 %v2089_v56, %v2085_v47 }
 0x430   : > { %v946_v57 = vsel %vm701_vm2, %v941_v55, 0 }
 0x431   : > { %1851 = vmatpush3.bf16.xpose.msra.mxu0 %v946_v57 }
 0x432   : > { %v2091_v58 = vpop.eup %2090  ;;  %1862 = vmatprep.subr.bf16.mxu0 %v2388_v17 }
 0x433   : > { %v770_v60 = vmul.f32 %v2091_v58, %v2087_v49  ;;  %v1062_v61 = vpop.permute.xlu1 %1061 }
 0x434   : > { %v1067_v1 = vsel %vm701_vm2, %v1062_v61, 0 }
 0x435   : > { %v771_v62 = vpack.c.bf16 %v770_v60, %v769_v59 }
 0x437   : > { %1835 = vmatmul.mubr.msk.bf16.vlgmr.msra.gmra.mrb[4].mxu1 %vm701_vm2, %v771_v62  ;;  %v1060_v2 = vpop.permute.xlu1 %1059 }
 0x438   : > { %1839 = vmatpush3.bf16.xpose.msra.mxu1 %v824_v0  ;;  %1853 = vmatmul.mubr.msk.bf16.vlgmr.msra.gmra.mrb[4].mxu0 %vm701_vm2, %v939_v63 }
 0x439   : > { %1863 = vmatpush3.bf16.xpose.msra.mxu0 %v1067_v1  ;;  %1840 = vmatprep.mubr.msk.bf16.mxu1 %vm2389_vm1, %v2388_v17 }
 0x43a   : > { %1864 = vmatprep.mubr.msk.bf16.mxu0 %vm2389_vm1, %v2388_v17  ;;  %1844 = vmatprep.subr.bf16.mxu1 %v2388_v17 }
 0x43b   : > { %1874 = vmatprep.subr.bf16.mxu0 %v2388_v17 }
 0x43f   : > { %1841 = vmatmul.mubr.msk.bf16.vlgmr.msra.gmra.mrb[8].mxu1 %vm701_vm2, %v817_v54 }
 0x440   : > { %1865 = vmatmul.mubr.msk.bf16.vlgmr.msra.gmra.mrb[8].mxu0 %vm701_vm2, %v1060_v2  ;;  %1846 = vmatprep.mubr.msk.bf16.mxu1 %vm2389_vm1, %v2388_v17 }
 0x441   : > { %1882 = vmatprep.mubr.msk.bf16.mxu0 %vm2389_vm1, %v2388_v17 }
 0x50a   : > { %v2798_v3 = vpop.f32.mrb[4].mxu1 }
 0x50b   : > { %v1836_v4 = vpop.f32.mrb[5].mxu1  ;;  %v982_v5 = vpop.f32.mrb[4].mxu0 }
 0x50c   : > { %v2800_v6 = vpop.f32.mrb[6].mxu1  ;;  %v1854_v7 = vpop.f32.mrb[5].mxu0  ;;  %v989_v24 = vsel %vm701_vm2, %v982_v5, -inf }
 0x50d   : > { %v1837_v8 = vpop.f32.mrb[7].mxu1  ;;  %v985_v9 = vpop.f32.mrb[6].mxu0 }
 0x50e   : > { %v1855_v10 = vpop.f32.mrb[7].mxu0  ;;  %v992_v26 = vsel %vm701_vm2, %v985_v9, -inf }
 0x512   : > { %v860_v11 = vpop.f32.mrb[8].mxu1 }
 0x513   : > { %v1842_v14 = vpop.f32.mrb[9].mxu1  ;;  %v1103_v15 = vpop.f32.mrb[8].mxu0  ;;  %v867_v16 = vsel %vm701_vm2, %v860_v11, -inf }
 0x514   : > { %v1866_v18 = vpop.f32.mrb[9].mxu0  ;;  %868 = vmax.xlane.f32.xlu1 %v867_v16  ;;  %v863_v19 = vpop.f32.mrb[10].mxu1  ;;  %v1110_v25 = vsel %vm701_vm2, %v1103_v15, -inf }
 0x515   : > { %v1843_v20 = vpop.f32.mrb[11].mxu1  ;;  %v1106_v21 = vpop.f32.mrb[10].mxu0  ;;  %v870_v22 = vsel %vm701_vm2, %v863_v19, -inf }
 0x516   : > { %v1867_v23 = vpop.f32.mrb[11].mxu0  ;;  %871 = vmax.xlane.f32.xlu0 %v870_v22  ;;  %v1113_v27 = vsel %vm701_vm2, %v1106_v21, -inf }
 0x517   : > { %v2072_v23 = vld [vmem:[#allocation7] sm:$0xff]  }
 0x518   : > { %990 = vmax.xlane.f32.xlu1 %v989_v24  ;;  %1875 = vmatpush3.bf16.msra.mxu0 %v2072_v23 }
 0x519   : > { %1876 = vmatprep.subr.bf16.mxu0 %v2388_v17 }
 0x51a   : > { %1111 = vmax.xlane.f32.xlu0 %v1110_v25 }
 0x51c   : > { %993 = vmax.xlane.f32.xlu1 %v992_v26  ;;  %v2073_v26 = vld [vmem:[#allocation7 + $0x8] sm:$0xff]  }
 0x51d   : > { %1877 = vmatpush3.bf16.msra.mxu0 %v2073_v26 }
 0x51e   : > { %1878 = vmatprep.subr.bf16.mxu0 %v2388_v17 }
 0x520   : > { %1114 = vmax.xlane.f32.xlu1 %v1113_v27 }
 0x5a1   : > { %v869_v28 = vpop.xlane.xlu1 %868 }
 0x5a2   : > { %v873_v34 = vsub.f32 %v860_v11, %v869_v28 }
 0x5a3   : > { %v872_v29 = vpop.xlane.xlu0 %871 }
 0x5a4   : > { %v875_v40 = vmul.f32 1.442695, %v873_v34  ;;  %v874_v41 = vsub.f32 %v863_v19, %v872_v29  ;;  %v2075_v34 = vld [vmem:[#allocation7 + $0x18] sm:$0xff]  }
 0x5a5   : > { %v991_v30 = vpop.xlane.xlu1 %990 }
 0x5a6   : > { %v995_v31 = vsub.f32 %v982_v5, %v991_v30  ;;  %v877_v45 = vmul.f32 1.442695, %v874_v41  ;;  %v2074_v30 = vld [vmem:[#allocation7 + $0x10] sm:$0xff]  }
 0x5a7   : > { %v1112_v33 = vpop.xlane.xlu0 %1111  ;;  %1879 = vmatpush3.bf16.msra.mxu0 %v2074_v30 }
 0x5a8   : > { %v997_v35 = vmul.f32 1.442695, %v995_v31  ;;  %v1116_v36 = vsub.f32 %v1103_v15, %v1112_v33  ;;  %1880 = vmatprep.subr.bf16.mxu0 %v2388_v17 }
 0x5a9   : > { %v994_v37 = vpop.xlane.xlu1 %993 }
 0x5aa   : > { %2092 = vpow2.f32 %v997_v35  ;;  %v1118_v38 = vmul.f32 1.442695, %v1116_v36  ;;  %v996_v39 = vsub.f32 %v985_v9, %v994_v37 }
 0x5ab   : > { %1881 = vmatpush3.bf16.msra.mxu0 %v2075_v34 }
 0x5ac   : > { %2094 = vpow2.f32 %v1118_v38  ;;  %v999_v42 = vmul.f32 1.442695, %v996_v39  ;;  %1898 = vmatprep.subr.bf16.mxu0 %v2388_v17 }
 0x5ad   : > { %v1115_v43 = vpop.xlane.xlu1 %1114 }
 0x5ae   : > { %2096 = vpow2.f32 %v999_v42  ;;  %v1117_v44 = vsub.f32 %v1106_v21, %v1115_v43 }
 0x5af   : > { %2098 = vpow2.f32 %v875_v40 }
 0x5b0   : > { %v1120_v46 = vmul.f32 1.442695, %v1117_v44 }
 0x5b2   : > { %2100 = vpow2.f32 %v1120_v46 }
 0x5b3   : > { %2102 = vpow2.f32 %v877_v45 }
 0x5b4   : > { %v2093_v47 = vpop.eup %2092 }
 0x5b5   : > { %v1001_v48 = vsel %vm701_vm2, %v2093_v47, 0.0 }
 0x5b6   : > { %v2095_v49 = vpop.eup %2094  ;;  %1002 = vadd.xlane.f32.xlu0 %v1001_v48 }
 0x5b7   : > { %v1122_v52 = vsel %vm701_vm2, %v2095_v49, 0.0 }
 0x5b8   : > { %v2097_v50 = vpop.eup %2096 }
 0x5b9   : > { %v1004_v51 = vsel %vm701_vm2, %v2097_v50, 0.0  ;;  %v2099_v53 = vpop.eup %2098 }
 0x5ba   : > { %1005 = vadd.xlane.f32.xlu1 %v1004_v51  ;;  %1123 = vadd.xlane.f32.xlu0 %v1122_v52  ;;  %v879_v56 = vsel %vm701_vm2, %v2099_v53, 0.0 }
 0x5bc   : > { %v2101_v54 = vpop.eup %2100 }
 0x5bd   : > { %v1125_v55 = vsel %vm701_vm2, %v2101_v54, 0.0  ;;  %v2103_v57 = vpop.eup %2102 }
 0x5be   : > { %1126 = vadd.xlane.f32.xlu1 %v1125_v55  ;;  %880 = vadd.xlane.f32.xlu0 %v879_v56  ;;  %v882_v58 = vsel %vm701_vm2, %v2103_v57, 0.0 }
 0x5c2   : > { %883 = vadd.xlane.f32.xlu1 %v882_v58 }
 0x5d3   : > { %1012 = vrot.lane.b32.xlu1 %v2761_v32, %s2392_s21  ;;  %s3015_s21 = sld [smem:[#allocation25_spill]] }
 0x5d4   : > { %891 = vrot.lane.b32.xlu0 %v2761_v32, %s2393_s1 }
 0x5d7   : > { %1133 = vrot.lane.b32.xlu1 %v2761_v32, %s2396_s29  ;;  %s3017_s29 = sld [smem:[#allocation17_spill]] }
 0x5dd   : > { %s1790_s17 = sshll.u32 %s3017_s29, 1 }
 0x643   : > { %v1003_v59 = vpop.xlane.xlu0 %1002 }
 0x647   : > { %v1006_v60 = vpop.xlane.xlu1 %1005  ;;  %v1124_v61 = vpop.xlane.xlu0 %1123 }
 0x64b   : > { %v1127_v62 = vpop.xlane.xlu1 %1126  ;;  %v881_v63 = vpop.xlane.xlu0 %880 }
 0x64c   : > { %2104 = vrcp.f32 %v881_v63 }
 0x64f   : > { %v884_v0 = vpop.xlane.xlu1 %883  ;;  %v892_v1 = vpop.permute.xlu0 %891 }
 0x650   : > { %2106 = vrcp.f32 %v884_v0  ;;  %1845 = vmatpush3.bf16.msra.mxu1 %v892_v1 }
 0x651   : > { %1856 = vmatprep.subr.bf16.mxu1 %v2388_v17  ;;  %2108 = vrcp.f32 %v1006_v60 }
 0x652   : > { %2110 = vrcp.f32 %v1003_v59  ;;  %v1767_v59 = vld [vmem:[%s3012_s25] ss:$0 sm:$0xff] }
 0x653   : > { %2112 = vrcp.f32 %v1127_v62  ;;  %v1013_v9 = vpop.permute.xlu1 %1012 }
 0x654   : > { %2114 = vrcp.f32 %v1124_v61 }
 0x656   : > { %v2105_v2 = vpop.eup %2104 }
 0x657   : > { %v887_v5 = vmul.f32 %v2105_v2, %v2099_v53  ;;  %v1134_v18 = vpop.permute.xlu1 %1133 }
 0x65a   : > { %v2107_v4 = vpop.eup %2106 }
 0x65b   : > { %v888_v7 = vmul.f32 %v2107_v4, %v2103_v57  ;;  %v2109_v8 = vpop.eup %2108 }
 0x65c   : > { %v2111_v10 = vpop.eup %2110  ;;  %v1010_v11 = vmul.f32 %v2109_v8, %v2097_v50 }
 0x65d   : > { %v889_v32 = vpack.c.bf16 %v888_v7, %v887_v5  ;;  %v1009_v14 = vmul.f32 %v2111_v10, %v2093_v47  ;;  %v2113_v16 = vpop.eup %2112 }
 0x65e   : > { %v2115_v19 = vpop.eup %2114  ;;  %v1131_v20 = vmul.f32 %v2113_v16, %v2101_v54  ;;  %v2076_v16 = vld [vmem:[#allocation8] sm:$0xff]  }
 0x65f   : > { %1847 = vmatmul.mubr.msk.bf16.vlgmr.msra.gmra.mrb[12].mxu1 %vm701_vm2, %v889_v32  ;;  %v1011_v15 = vpack.c.bf16 %v1010_v11, %v1009_v14  ;;  %v1130_v21 = vmul.f32 %v2115_v19, %v2095_v49  ;;  %v2079_v19 = vld [vmem:[#allocation8 + $0x18] sm:$0xff]  }
 0x660   : > { %1857 = vmatpush3.bf16.msra.mxu1 %v1013_v9  ;;  %1858 = vmatprep.mubr.msk.bf16.mxu1 %vm2389_vm1, %v2388_v17 }
 0x661   : > { %1868 = vmatprep.subr.bf16.mxu1 %v2388_v17  ;;  %v1132_v22 = vpack.c.bf16 %v1131_v20, %v1130_v21 }
 0x667   : > { %1859 = vmatmul.mubr.msk.bf16.vlgmr.msra.gmra.mrb[16].mxu1 %vm701_vm2, %v1011_v15 }
 0x668   : > { %1869 = vmatpush3.bf16.msra.mxu1 %v1134_v18  ;;  %1870 = vmatprep.mubr.msk.bf16.mxu1 %vm2389_vm1, %v2388_v17  ;;  %v2078_v18 = vld [vmem:[#allocation8 + $0x10] sm:$0xff]  }
 0x669   : > { %1886 = vmatprep.subr.bf16.mxu1 %v2388_v17 }
 0x66f   : > { %1871 = vmatmul.mubr.msk.bf16.vlgmr.msra.gmra.mrb[20].mxu1 %vm701_vm2, %v1132_v22 }
 0x670   : > { %1894 = vmatprep.mubr.msk.bf16.mxu1 %vm2389_vm1, %v2388_v17  ;;  %1887 = vmatpush3.bf16.msra.mxu1 %v2076_v16 }
 0x671   : > { %1888 = vmatprep.subr.bf16.mxu1 %v2388_v17 }
 0x732   : > { %v931_v24 = vpop.f32.mrb[12].mxu1 }
 0x733   : > { %v1848_v25 = vpop.f32.mrb[13].mxu1 }
 0x734   : > { %v934_v27 = vpop.f32.mrb[14].mxu1 }
 0x735   : > { %v2045_v28 = vpack.i.bf16 %v934_v27, %v931_v24  ;;  %v1849_v29 = vpop.f32.mrb[15].mxu1  ;;  %v1773_v27 = vld [vmem:[%s3013_s11] ss:$0 sm:$0xff]  ;;  %s1590_s11 = sadd.s32 %s1791_s27, %s1790_s17  ;;  %s1578_s17 = scalar_lea.sflag [#allocation4], %s2722_s7 }
 0x736   : > { %s1792_s5 = sshll.u32 %s1590_s11, 7  ;;  %s2397_s27 = smov [#allocation11]  }
 0x737   : > { %2046 = vrot.lane.b32.xlu0 %v2045_v28, %s2395_s14  ;;  %s3016_s14 = sld [smem:[#allocation26_spill]]  ;;  %s2274_s25 = sshll.u32 %s2397_s27, 4  ;;  %s2275_s25 = int_to_ptr.vmem [resolvable:$false] %s2274_s25 }
 0x738   : > { %s2276_s24 = scalar_lea.vmem %s2275_s25, 512 }
 0x73a   : > { %v1052_v31 = vpop.f32.mrb[16].mxu1 }
 0x73b   : > { %v1860_v33 = vpop.f32.mrb[17].mxu1 }
 0x73c   : > { %v1055_v35 = vpop.f32.mrb[18].mxu1  ;;  %v1774_v33 = vld [vmem:[%s3014_s26] ss:$0 sm:$0xff]  ;;  %s3019_s26 = sld [smem:[#allocation30_spill]] }
 0x73d   : > { %v2050_v36 = vpack.i.bf16 %v1055_v35, %v1052_v31  ;;  %v1861_v37 = vpop.f32.mrb[19].mxu1 }
 0x73f   : > { %2051 = vrot.lane.b32.xlu1 %v2050_v36, %s2394_s16  ;;  %s3020_s16 = sld [smem:[#allocation31_spill]] }
 0x742   : > { %v1173_v38 = vpop.f32.mrb[20].mxu1 }
 0x743   : > { %v1872_v39 = vpop.f32.mrb[21].mxu1 }
 0x744   : > { %v1176_v40 = vpop.f32.mrb[22].mxu1  ;;  %v2081_v39 = vld [vmem:[#allocation10 + $0x8] sm:$0xff]  }
 0x745   : > { %v2055_v41 = vpack.i.bf16 %v1176_v40, %v1173_v38  ;;  %v1873_v42 = vpop.f32.mrb[23].mxu1  ;;  %v2080_v38 = vld [vmem:[#allocation10] sm:$0xff]   ;;  %v2082_v40 = vld [vmem:[#allocation10 + $0x10] sm:$0xff]   ;;  %s2892_s29 = scalar_lea.hbm %s3020_s16, %s1792_s5 }
 0x746   : > { %v1775_v42 = vld [vmem:[%s3015_s21] ss:$0 sm:$0xff] }
 0x747   : > { %2056 = vrot.lane.b32.xlu0 %v2055_v41, %s2391_s13  ;;  %v2083_v41 = vld [vmem:[#allocation10 + $0x18] sm:$0xff]   ;;  %s572_s13 = scalar_lea.vmem [#allocation11], %s1743_s2 }
 0x748   : > { %s1593_s4 = sshll.u32 %s572_s13, 4  ;;  %s2894_s4 = int_to_ptr.vmem [resolvable:$true] %s1593_s4 }
 0x749   : > { %s2270_s2 = scalar_lea.vmem %s2894_s4, 256  ;;  %p2277_p13 = scmp.lt.s32.totalorder %s2894_s4, %s2275_s25 }
 0x74a   : > { %p2271_p10 = scmp.ne.s32.totalorder %s2894_s4, %s2270_s2  ;;  %p2278_p3 = scmp.lt.s32.totalorder %s2276_s24, %s2270_s2 }
 0x74c   : > { %p2272_p6 = pnand %p2271_p10, %p2658_p8  ;;  %p2279_p7 = por %p2278_p3, %p2277_p13 }
 0x74e   : > { %p2273_p11 = pneg %p2272_p6 }
 0x750   : > { %p2280_p12 = pnand %p2279_p7, %p2273_p11 }
 0x7a9   : > { %v2047_v43 = vpop.permute.xlu0 %2046 }
 0x7aa   : > { %v2049_v45 = vunpack.i.h.bf16 %v2047_v43  ;;  %v2048_v46 = vunpack.i.l.bf16 %v2047_v43 }
 0x7ac   : > { %v1205_v50 = vsel %vm701_vm2, %v2800_v6, %v2049_v45  ;;  %v1204_v51 = vsel %vm701_vm2, %v2798_v3, %v2048_v46 }
 0x7b1   : > { %v2052_v44 = vpop.permute.xlu1 %2051 }
 0x7b2   : > { %v2054_v47 = vunpack.i.h.bf16 %v2052_v44  ;;  %v2053_v48 = vunpack.i.l.bf16 %v2052_v44 }
 0x7b4   : > { %v1208_v54 = vsel %vm1206_vm3, %v1205_v50, %v2054_v47  ;;  %v1207_v55 = vsel %vm1206_vm3, %v1204_v51, %v2053_v48 }
 0x7b9   : > { %v2057_v49 = vpop.permute.xlu0 %2056 }
 0x7ba   : > { %v2059_v52 = vunpack.i.h.bf16 %v2057_v49  ;;  %v2058_v53 = vunpack.i.l.bf16 %v2057_v49 }
 0x7bc   : > { %v1211_v56 = vsel %vm1209_vm4, %v1208_v54, %v2059_v52  ;;  %v1210_v57 = vsel %vm1209_vm4, %v1207_v55, %v2058_v53 }
 0x7bd   : > { %v1212_v58 = vpack.c.bf16 %v1211_v56, %v1210_v57 }
 0x7bf   : > { %1883 = vmatmul.mubr.msk.bf16.vlgmr.msra.gmra.mrb[12].mxu0 %vm649_vm0, %v1212_v58 }
 0x7c0   : > { %1906 = vmatprep.mubr.msk.bf16.mxu0 %vm2389_vm1, %v2388_v17  ;;  %1899 = vmatpush3.bf16.msra.mxu0 %v2080_v38 }
 0x7c1   : > { %1900 = vmatprep.subr.bf16.mxu0 %v2388_v17 }
 0x7c4   : > { %1901 = vmatpush3.bf16.msra.mxu0 %v2081_v39 }
 0x7c5   : > { %1902 = vmatprep.subr.bf16.mxu0 %v2388_v17 }
 0x7c8   : > { %1903 = vmatpush3.bf16.msra.mxu0 %v2082_v40 }
 0x7c9   : > { %1904 = vmatprep.subr.bf16.mxu0 %v2388_v17 }
 0x7cc   : > { %1905 = vmatpush3.bf16.msra.mxu0 %v2083_v41 }
 0x892   : > { %v1289_v6 = vpop.f32.mrb[12].mxu0 }
 0x893   : > { %v1290_v60 = vadd.f32 %v1767_v59, %v1289_v6  ;;  %v1884_v61 = vpop.f32.mrb[13].mxu0 }
 0x894   : > { %v1292_v3 = vpop.f32.mrb[14].mxu0 }
 0x895   : > { %v1293_v62 = vadd.f32 %v1767_v59, %v1292_v3  ;;  %v1885_v63 = vpop.f32.mrb[15].mxu0  ;;  %v1296_v0 = vadd.f32 %v1290_v60, %v2745_v12 }
 0x897   : > { %v1300_v1 = vsel %vm649_vm0, %v1296_v0, 0.0  ;;  %v1297_v2 = vadd.f32 %v1293_v62, %v2747_v13  ;;  %v2077_v13 = vld [vmem:[#allocation8 + $0x8] sm:$0xff]  }
 0x898   : > { %1301 = vadd.xlane.f32.xlu1 %v1300_v1  ;;  %1889 = vmatpush3.bf16.msra.mxu1 %v2077_v13  ;;  %v1781_v1 = vld [vmem:[%s3016_s14] ss:$0 sm:$0xff]  ;;  %s3021_s14 = smov %s3020_s16 }
 0x899   : > { %v1303_v4 = vsel %vm649_vm0, %v1297_v2, 0.0  ;;  %1890 = vmatprep.subr.bf16.mxu1 %v2388_v17 }
 0x89a   : > { %1304 = vadd.xlane.f32.xlu0 %v1303_v4 }
 0x89c   : > { %1891 = vmatpush3.bf16.msra.mxu1 %v2078_v18 }
 0x89d   : > { %1892 = vmatprep.subr.bf16.mxu1 %v2388_v17 }
 0x8a0   : > { %1893 = vmatpush3.bf16.msra.mxu1 %v2079_v19 }
 0x925   : > { %v1302_v5 = vpop.xlane.xlu1 %1301 }
 0x926   : > { %v1307_v7 = vmul.f32 0.015625, %v1302_v5 }
 0x927   : > { %v1305_v32 = vpop.xlane.xlu0 %1304 }
 0x928   : > { %v1309_v8 = vsub.f32 %v1296_v0, %v1307_v7  ;;  %v1308_v9 = vmul.f32 0.015625, %v1305_v32 }
 0x92a   : > { %v1310_v10 = vsub.f32 %v1297_v2, %v1308_v9  ;;  %v1311_v11 = vmul.f32 %v1309_v8, %v1309_v8 }
 0x92c   : > { %v1313_v14 = vsel %vm649_vm0, %v1311_v11, 0.0  ;;  %v1312_v15 = vmul.f32 %v1310_v10, %v1310_v10 }
 0x92d   : > { %1314 = vadd.xlane.f32.xlu0 %v1313_v14 }
 0x92e   : > { %v1316_v12 = vsel %vm649_vm0, %v1312_v15, 0.0 }
 0x92f   : > { %1317 = vadd.xlane.f32.xlu1 %v1316_v12 }
 0x9ba   : > { %v1315_v20 = vpop.xlane.xlu0 %1314 }
 0x9bb   : > { %v1319_v21 = vmul.f32 0.015625, %v1315_v20 }
 0x9bc   : > { %v1318_v22 = vpop.xlane.xlu1 %1317 }
 0x9bd   : > { %v1321_v23 = vadd.f32 1e-05, %v1319_v21  ;;  %v1320_v24 = vmul.f32 0.015625, %v1318_v22 }
 0x9bf   : > { %2116 = vrsqrt.f32 %v1321_v23  ;;  %v1322_v25 = vadd.f32 1e-05, %v1320_v24 }
 0x9c1   : > { %2118 = vrsqrt.f32 %v1322_v25 }
 0x9c9   : > { %v2117_v26 = vpop.eup %2116 }
 0x9ca   : > { %v1325_v28 = vmul.f32 %v2117_v26, %v1309_v8 }
 0x9cb   : > { %v2119_v29 = vpop.eup %2118 }
 0x9cc   : > { %v1333_v30 = vmul.f32 %v1773_v27, %v1325_v28  ;;  %v1326_v31 = vmul.f32 %v2119_v29, %v1310_v10 }
 0x9ce   : > { %v1334_v34 = vmul.f32 %v1773_v27, %v1326_v31  ;;  %v1341_v35 = vadd.f32 %v1774_v33, %v1333_v30  ;;  %v1787_v31 = vld [vmem:[%s3018_s10] ss:$0 sm:$0xff] }
 0x9d0   : > { %v1342_v36 = vadd.f32 %v1774_v33, %v1334_v34 }
 0x9d2   : > { %v1343_v37 = vpack.c.bf16 %v1342_v36, %v1341_v35 }
 0x9d4   : > { %1895 = vmatmul.mubr.msk.bf16.vlgmr.msra.gmra.mrb[24].mxu1 %vm649_vm0, %v1343_v37 }
 0xaa7   : > { %v1420_v43 = vpop.f32.mrb[24].mxu1 }
 0xaa8   : > { %v1421_v44 = vadd.f32 %v1775_v42, %v1420_v43  ;;  %v1896_v45 = vpop.f32.mrb[25].mxu1 }
 0xaa9   : > { %v1423_v46 = vpop.f32.mrb[26].mxu1 }
 0xaaa   : > { %v1427_v47 = vmul.f32 %v1421_v44, %v1421_v44  ;;  %v1424_v48 = vadd.f32 %v1775_v42, %v1423_v46  ;;  %v1897_v49 = vpop.f32.mrb[27].mxu1 }
 0xaac   : > { %v1429_v50 = vmul.f32 %v1427_v47, %v1421_v44  ;;  %v1428_v51 = vmul.f32 %v1424_v48, %v1424_v48 }
 0xaae   : > { %v1431_v52 = vmul.f32 0.044715, %v1429_v50  ;;  %v1430_v53 = vmul.f32 %v1428_v51, %v1424_v48 }
 0xab0   : > { %v1433_v54 = vadd.f32 %v1431_v52, %v1421_v44  ;;  %v1432_v55 = vmul.f32 0.044715, %v1430_v53 }
 0xab2   : > { %v1435_v17 = vmul.f32 0.7978846, %v1433_v54  ;;  %v1434_v56 = vadd.f32 %v1432_v55, %v1424_v48 }
 0xab4   : > { %2120 = vtanh.f32 %v1435_v17  ;;  %v1436_v57 = vmul.f32 0.7978846, %v1434_v56 }
 0xab6   : > { %2122 = vtanh.f32 %v1436_v57 }
 0xabe   : > { %v2121_v58 = vpop.eup %2120 }
 0xabf   : > { %v1439_v59 = vadd.f32 1.0, %v2121_v58 }
 0xac0   : > { %v2123_v6 = vpop.eup %2122 }
 0xac1   : > { %v1441_v60 = vmul.f32 0.5, %v1439_v59  ;;  %v1440_v61 = vadd.f32 1.0, %v2123_v6 }
 0xac3   : > { %v1442_v3 = vmul.f32 0.5, %v1440_v61  ;;  %v1443_v62 = vmul.f32 %v1441_v60, %v1421_v44 }
 0xac5   : > { %v1444_v63 = vmul.f32 %v1442_v3, %v1424_v48 }
 0xac7   : > { %v1445_v0 = vpack.c.bf16 %v1444_v63, %v1443_v62 }
 0xac9   : > { %1907 = vmatmul.mubr.msk.bf16.vlgmr.msra.gmra.mrb[16].mxu0 %vm649_vm0, %v1445_v0 }
 0xb9c   : > { %v1522_v2 = vpop.f32.mrb[16].mxu0 }
 0xb9d   : > { %v1523_v4 = vadd.f32 %v1781_v1, %v1522_v2  ;;  %v1908_v5 = vpop.f32.mrb[17].mxu0 }
 0xb9e   : > { %v1525_v7 = vpop.f32.mrb[18].mxu0 }
 0xb9f   : > { %v1526_v32 = vadd.f32 %v1781_v1, %v1525_v7  ;;  %v1909_v8 = vpop.f32.mrb[19].mxu0  ;;  %v1529_v9 = vadd.f32 %v1523_v4, %v1341_v35  ;;  %v1788_v35 = vld [vmem:[%s3019_s26] ss:$0 sm:$0xff] }
 0xba1   : > { %v1533_v10 = vsel %vm649_vm0, %v1529_v9, 0.0  ;;  %v1530_v11 = vadd.f32 %v1526_v32, %v1342_v36 }
 0xba2   : > { %1534 = vadd.xlane.f32.xlu0 %v1533_v10 }
 0xba3   : > { %v1536_v14 = vsel %vm649_vm0, %v1530_v11, 0.0 }
 0xba4   : > { %1537 = vadd.xlane.f32.xlu1 %v1536_v14 }
 0xc2f   : > { %v1535_v15 = vpop.xlane.xlu0 %1534 }
 0xc30   : > { %v1539_v12 = vmul.f32 0.015625, %v1535_v15 }
 0xc31   : > { %v1538_v16 = vpop.xlane.xlu1 %1537 }
 0xc32   : > { %v1541_v13 = vsub.f32 %v1529_v9, %v1539_v12  ;;  %v1540_v18 = vmul.f32 0.015625, %v1538_v16 }
 0xc34   : > { %v1542_v19 = vsub.f32 %v1530_v11, %v1540_v18  ;;  %v1543_v20 = vmul.f32 %v1541_v13, %v1541_v13 }
 0xc36   : > { %v1545_v21 = vsel %vm649_vm0, %v1543_v20, 0.0  ;;  %v1544_v22 = vmul.f32 %v1542_v19, %v1542_v19 }
 0xc37   : > { %1546 = vadd.xlane.f32.xlu0 %v1545_v21 }
 0xc38   : > { %v1548_v23 = vsel %vm649_vm0, %v1544_v22, 0.0 }
 0xc39   : > { %1549 = vadd.xlane.f32.xlu1 %v1548_v23 }
 0xcc4   : > { %v1547_v24 = vpop.xlane.xlu0 %1546 }
 0xcc5   : > { %v1551_v25 = vmul.f32 0.015625, %v1547_v24 }
 0xcc6   : > { %v1550_v26 = vpop.xlane.xlu1 %1549 }
 0xcc7   : > { %v1553_v27 = vadd.f32 1e-05, %v1551_v25  ;;  %v1552_v28 = vmul.f32 0.015625, %v1550_v26 }
 0xcc9   : > { %2124 = vrsqrt.f32 %v1553_v27  ;;  %v1554_v29 = vadd.f32 1e-05, %v1552_v28 }
 0xccb   : > { %2126 = vrsqrt.f32 %v1554_v29 }
 0xcd3   : > { %v2125_v30 = vpop.eup %2124 }
 0xcd4   : > { %v1557_v33 = vmul.f32 %v2125_v30, %v1541_v13 }
 0xcd5   : > { %v2127_v34 = vpop.eup %2126 }
 0xcd6   : > { %v1565_v36 = vmul.f32 %v1787_v31, %v1557_v33  ;;  %v1558_v37 = vmul.f32 %v2127_v34, %v1542_v19 }
 0xcd8   : > { %v1573_v38 = vadd.f32 %v1788_v35, %v1565_v36  ;;  %v1566_v39 = vmul.f32 %v1787_v31, %v1558_v37 }
 0xcda   : > { %v1574_v40 = vadd.f32 %v1788_v35, %v1566_v39  ;;  %1575 = vst.msk [vmem:[%s572_s13] sm:$0xff] %vm649_vm0, %v1573_v38 }
 0xcdc   : > { %1576 = vst.msk [vmem:[%s572_s13 + $0x8] sm:$0xff] %vm649_vm0, %v1574_v40 }
 0xcdd   : > { %2283 = shalt.err (!%p2280_p12)
}
 0xcde   : > { %s2284_s10 = scalar_lea.hbm %s2892_s29, 256  ;;  %s2288_s12 = scalar_lea.hbm %s3021_s14, 2048 }
 0xcdf   : > { %p2285_p1 = scmp.ne.s32.totalorder %s2892_s29, %s2284_s10  ;;  %p2289_p9 = scmp.lt.u32.totalorder %s2892_s29, %s3021_s14 }
 0xce0   : > { %p2290_p0 = scmp.lt.u32.totalorder %s2288_s12, %s2284_s10  ;;  %p2292_p10 = scmp.lt.u32.totalorder %s2284_s10, %s2892_s29 }
 0xce1   : > { %p2286_p2 = pnand %p2285_p1, %p2658_p8 }
 0xce2   : > { %p2291_p4 = por %p2290_p0, %p2289_p9 }
 0xce3   : > { %p2287_p5 = pneg %p2286_p2 }
 0xce4   : > { %p2293_p6 = por %p2292_p10, %p2291_p4 }
 0xce6   : > { %p2294_p11 = pnand %p2293_p6, %p2287_p5 }
 0xce8   : > { %2297 = shalt.err (!%p2294_p11)
}
 0xce9   : > { %s2398_s13 = smov 128   ;;  %s2399_s21 = smov 8  }
 0xcea   : > { %1928 = dma.vmem_to_hbm [thread:$0]  (%p2658_p8), %s2894_s4, 256, %s2892_s29, %s1578_s17, %s2398_s13, %s2398_s13, %s2399_s21  }
 0xceb PF: > { %s3022_s1 = sld [smem:[#allocation16_spill]]  ;;  %s3023_s16 = sld [smem:[#allocation19_spill]] }
 0xcec   : > { %p1960_p13 = scmp.ge.s32.totalorder %s2376_s20, 2 }
 0xcf1   : > { %s1608_s2 = sand.u32 1, %s3022_s1   ;;  %p3024_p3 = scmp.ne.s32.totalorder %s3023_s16, 0 }
 0xcf2   : > { %s1609_s27 = scalar_lea.sflag [#allocation4], %s1608_s2 }
 0xcf3   : > { %p1948_p7 = pnand %p1960_p13, %p3024_p3 }
 0xcf5   : > { %2343 = dma.done.wait (!%p1948_p7), %s1609_s27, 256  }
 0xcf6   : > { %2345 = vsyncadd (!%p1948_p7), %s1609_s27, 4294967040  ;;  %s32_s20 = sadd.s32 1, %s2376_s20   ;;  %s3025_s29 = smov %s2352_s30 }
 0xcf7   : > { %p29_p12 = scmp.ge.s32.totalorder %s32_s20, 10   ;;  %s3026_s30 = smov %s2356_s15 }
 0xcf8   : > { %s3027_s15 = smov %s2671_s9  ;;  %s3028_s16 = smov %s2368_s18 }
 0xcf9   : > { %s3029_s17 = smov %s2372_s19  ;;  %s3030_s18 = smov %s3033_s28 }
 0xcfa   : > { %s3031_s19 = smov %s3037_s22  ;;  %31 = sbr.rel (!%p29_p12) target bundleno = 22 (0x16), region = 140 }
 0xd01   :  { %1614 = vsyncpa [#allocation3], 1 }
 0xd02   :  { %1616 = vsyncpa [#allocation3 + $0x1], 1 }
 0xd03   :  { %1617 = vsyncpa [#allocation6], 1 }
 0xd04   :  { %1618 = vsyncpa [#allocation9], 1 }
 0xd05   :  { %1619 = vsyncpa [#allocation4], 1 }
 0xd06   :  { %1621 = vsyncpa [#allocation4 + $0x1], 1 }

</bundles_post_ra>
